<compile_context>
chip_gen: v5e
topology: v5e:2x2
jax: 0.10.0
libtpu: 0.0.40
codegen_flags: <defaults>
</compile_context>

<pallas_src>
import jax
import jax.numpy as jnp
from jax import lax
from jax.experimental import pallas as pl
from jax.experimental.pallas import tpu as pltpu


# ---------------------------------------------------------------------------
# Fused Pallas kernel (all LSTM layers + final Linear)
# ---------------------------------------------------------------------------
def _make_lstm_forecast_kernel(num_layers):
    def kernel(x_ref, *args):
        n_w = 3 * num_layers
        layer_refs = [args[3 * l: 3 * l + 3] for l in range(num_layers)]
        fc_w_ref = args[n_w]
        fc_b_ref = args[n_w + 1]
        out_ref = args[n_w + 2]
        gates_scr, seq_scr, h_scr, c_scr = args[n_w + 3: n_w + 7]

        bb, T, _ = x_ref.shape          # batch block, sequence length
        H = h_scr.shape[-1]
        unroll = T <= 32                # short fixed trip-count -> full unroll

        for l, (wx_ref, wh_ref, b_ref) in enumerate(layer_refs):
            is_last = l == num_layers - 1

            # ---- hoisted input projection: x_t @ W_ih + b for ALL timesteps ----
            # One (T, F) x (F, 4H) MXU matmul per batch row instead of T tiny
            # per-step matmuls; also folds the bias add out of the recurrence.
            for b in range(bb):
                if l == 0:
                    inp_b = x_ref[b]                                  # (T, F_in)
                else:
                    inp_b = seq_scr[:, b:b + 1, :].reshape(T, H)      # (T, H)
                pre_b = (
                    jnp.dot(inp_b.astype(wx_ref.dtype), wx_ref[...],
                            preferred_element_type=jnp.float32)
                    + b_ref[...]
                )                                                     # (T, 4H)
                gates_scr[:, b:b + 1, :] = pre_b[:, None, :]

            # ---- recurrence: only h_{t-1} @ W_hh remains per step ----
            h_scr[...] = jnp.zeros_like(h_scr)
            c_scr[...] = jnp.zeros_like(c_scr)

            def step(t, carry, wh_ref=wh_ref, is_last=is_last):
                g = gates_scr[t] + jnp.dot(
                    h_scr[...].astype(wh_ref.dtype), wh_ref[...],
                    preferred_element_type=jnp.float32)               # (bb, 4H)
                # gates packed as [i, f, o, g]: one sigmoid slab + one tanh slab
                sig = jax.nn.sigmoid(g[:, : 3 * H])
                g_in = jnp.tanh(g[:, 3 * H:])
                i_g = sig[:, :H]
                f_g = sig[:, H: 2 * H]
                o_g = sig[:, 2 * H: 3 * H]
                c_new = f_g * c_scr[...] + i_g * g_in
                h_new = o_g * jnp.tanh(c_new)
                c_scr[...] = c_new
                h_scr[...] = h_new
                if not is_last:
                    seq_scr[t] = h_new    # feeds the next layer; never leaves VMEM
                return carry

            lax.fori_loop(0, T, step, 0, unroll=unroll)

        # ---- fused final Linear on the last timestep's hidden state ----
        out = (
            jnp.dot(h_scr[...].astype(fc_w_ref.dtype), fc_w_ref[...],
                    preferred_element_type=jnp.float32)
            + fc_b_ref[...]
        )
        out_ref[...] = out.astype(out_ref.dtype)

    return kernel


# ---------------------------------------------------------------------------
# Wrapper
# ---------------------------------------------------------------------------
def lstm_forecast_forward(x, params, *, batch_block=None):
    """Fused LSTMForecast forward.

    x: (B, T, input_size)  -- PyTorch batch_first layout (consumed directly).
    params: output of prepare_pallas_params().
    Returns (B, output_size).
    """
    B, T, F_in = x.shape
    layers = params["layers"]
    fc_w, fc_b = params["fc_w"], params["fc_b"]
    num_layers = len(layers)
    H = layers[0][1].shape[0]
    O = fc_w.shape[1]

    bb = B if batch_block is None else batch_block
    # (bb, O) output-block rule: bb must be the full batch or a multiple of 8.
    # batch_block < B exposes a "parallel" grid axis that v7x's second TensorCore
    # can pick up (no effect on v5e/v6e single-TC chips).
    if bb != B:
        assert B % bb == 0 and bb % 8 == 0, \
            "batch_block must divide B and be a multiple of 8"
    n_blk = B // bb

    const2 = lambda i: (0, 0)
    in_specs = [pl.BlockSpec((bb, T, F_in), lambda i: (i, 0, 0))]
    flat_weights = []
    for (wx, wh, b) in layers:
        # Weights/bias are grid-invariant and stay resident for the whole call.
        # TODO(synk): at production H, single-buffer these (or DMA once to scratch)
        # to halve their VMEM footprint on v7x's 64 MiB budget.
        in_specs += [pl.BlockSpec(wx.shape, const2),
                     pl.BlockSpec(wh.shape, const2),
                     pl.BlockSpec(b.shape, const2)]
        flat_weights += [wx, wh, b]
    in_specs += [pl.BlockSpec(fc_w.shape, const2),
                 pl.BlockSpec(fc_b.shape, const2)]

    kernel = _make_lstm_forecast_kernel(num_layers)

    return pl.pallas_call(
        kernel,
        out_shape=jax.ShapeDtypeStruct((B, O), x.dtype),
        grid_spec=pltpu.PrefetchScalarGridSpec(
            num_scalar_prefetch=0,
            grid=(n_blk,),
            in_specs=in_specs,
            out_specs=pl.BlockSpec((bb, O), lambda i: (i, 0)),
            scratch_shapes=[
                pltpu.VMEM((T, bb, 4 * H), jnp.float32),  # hoisted pre-gates
                pltpu.VMEM((T, bb, H), jnp.float32),      # inter-layer hidden seq
                pltpu.VMEM((bb, H), jnp.float32),         # h state
                pltpu.VMEM((bb, H), jnp.float32),         # c state
            ],
        ),
        compiler_params=pltpu.CompilerParams(
            dimension_semantics=("parallel",),  # batch blocks are independent
        ),
    )(x, *flat_weights, fc_w, fc_b)


# ---------------------------------------------------------------------------
# Parameters: PyTorch-layout init + repacking for the kernel
# ---------------------------------------------------------------------------
def init_params(key, input_size, hidden_size, num_layers, output_size):
    """PyTorch-layout params: W_ih (4H,F), W_hh (4H,H), b_ih/b_hh (4H,),
    fc W (O,H), fc b (O,); gate order i,f,g,o; U(-1/sqrt(H), 1/sqrt(H))."""
    H = hidden_size
    bound = 1.0 / float(H) ** 0.5
    lstm = []
    for l in range(num_layers):
        f_in = input_size if l == 0 else H
        key, k1, k2, k3, k4 = jax.random.split(key, 5)
        lstm.append({
            "w_ih": jax.random.uniform(k1, (4 * H, f_in), jnp.float32, -bound, bound),
            "w_hh": jax.random.uniform(k2, (4 * H, H), jnp.float32, -bound, bound),
            "b_ih": jax.random.uniform(k3, (4 * H,), jnp.float32, -bound, bound),
            "b_hh": jax.random.uniform(k4, (4 * H,), jnp.float32, -bound, bound),
        })
    key, k5, k6 = jax.random.split(key, 3)
    fc_w = jax.random.uniform(k5, (output_size, H), jnp.float32, -bound, bound)
    fc_b = jax.random.uniform(k6, (output_size,), jnp.float32, -bound, bound)
    return {"lstm": lstm, "fc_w": fc_w, "fc_b": fc_b}


def prepare_pallas_params(torch_params, weights_dtype=jnp.float32):
    """Repack PyTorch-layout params for the kernel:
      * transpose to right-multiply form (x @ Wx, h @ Wh),
      * fold b_ih + b_hh into one bias row,
      * permute gate columns i,f,g,o -> i,f,o,g (one sigmoid slab + one tanh slab),
      * optionally cast the matmul weights (e.g. bf16 on v6e/v7x); biases stay f32.
    """
    layers = []
    for layer in torch_params["lstm"]:
        H = layer["w_hh"].shape[1]
        perm = jnp.concatenate([
            jnp.arange(0 * H, 1 * H),   # i
            jnp.arange(1 * H, 2 * H),   # f
            jnp.arange(3 * H, 4 * H),   # o
            jnp.arange(2 * H, 3 * H),   # g
        ])
        wx = layer["w_ih"].T[:, perm].astype(weights_dtype)       # (F, 4H)
        wh = layer["w_hh"].T[:, perm].astype(weights_dtype)       # (H, 4H)
        b = (layer["b_ih"] + layer["b_hh"])[perm][None, :].astype(jnp.float32)
        layers.append((wx, wh, b))
    fc_w = torch_params["fc_w"].T.astype(weights_dtype)           # (H, O)
    fc_b = torch_params["fc_b"][None, :].astype(jnp.float32)      # (1, O)
    return {"layers": layers, "fc_w": fc_w, "fc_b": fc_b}


# ---------------------------------------------------------------------------
# Pure-JAX reference (PyTorch nn.LSTM semantics, original gate order)
# ---------------------------------------------------------------------------
def reference_forward(x, torch_params):
    B = x.shape[0]
    h_seq = x
    for layer in torch_params["lstm"]:
        w_ih, w_hh = layer["w_ih"], layer["w_hh"]
        b = layer["b_ih"] + layer["b_hh"]
        H = w_hh.shape[1]
        hs = jnp.zeros((B, H), jnp.float32)
        cs = jnp.zeros((B, H), jnp.float32)
        outs = []
        for t in range(h_seq.shape[1]):
            gates = h_seq[:, t, :] @ w_ih.T + hs @ w_hh.T + b
            i_g = jax.nn.sigmoid(gates[:, 0 * H:1 * H])
            f_g = jax.nn.sigmoid(gates[:, 1 * H:2 * H])
            g_g = jnp.tanh(gates[:, 2 * H:3 * H])
            o_g = jax.nn.sigmoid(gates[:, 3 * H:4 * H])
            cs = f_g * cs + i_g * g_g
            hs = o_g * jnp.tanh(cs)
            outs.append(hs)
        h_seq = jnp.stack(outs, axis=1)
    return h_seq[:, -1, :] @ torch_params["fc_w"].T + torch_params["fc_b"]


# ---------------------------------------------------------------------------
if __name__ == "__main__":
    B, T = 2, 8
    input_size, hidden_size, num_layers, output_size = 4, 32, 2, 4

    key = jax.random.PRNGKey(0)
    key, kx = jax.random.split(key)
    x = jax.random.normal(kx, (B, T, input_size), jnp.float32)

    torch_params = init_params(key, input_size, hidden_size, num_layers, output_size)
    params = prepare_pallas_params(torch_params)   # f32 weights (bf16 optional on v6e/v7x)

    out = lstm_forecast_forward(x, params)
    out = jax.block_until_ready(out)

    ref = reference_forward(x, torch_params)
    assert out.shape == (B, output_size)
    assert jnp.allclose(out, ref, atol=1e-5, rtol=1e-5), "mismatch vs JAX reference"

    print("KERNEL_OK")
</pallas_src>

<mosaic_0001>
module attributes {stable_mosaic.version = 11 : i64} {
  func.func @kernel(%arg0: i32, %arg1: memref<2x8x4xf32, #tpu.memory_space<vmem>>, %arg2: memref<4x128xf32, #tpu.memory_space<vmem>>, %arg3: memref<32x128xf32, #tpu.memory_space<vmem>>, %arg4: memref<1x128xf32, #tpu.memory_space<vmem>>, %arg5: memref<32x128xf32, #tpu.memory_space<vmem>>, %arg6: memref<32x128xf32, #tpu.memory_space<vmem>>, %arg7: memref<1x128xf32, #tpu.memory_space<vmem>>, %arg8: memref<32x4xf32, #tpu.memory_space<vmem>>, %arg9: memref<1x4xf32, #tpu.memory_space<vmem>>, %arg10: memref<2x4xf32, #tpu.memory_space<vmem>>, %arg11: memref<8x2x128xf32, #tpu.memory_space<vmem>>, %arg12: memref<8x2x32xf32, #tpu.memory_space<vmem>>, %arg13: memref<2x32xf32, #tpu.memory_space<vmem>>, %arg14: memref<2x32xf32, #tpu.memory_space<vmem>>) attributes {dimension_semantics = [#tpu.dimension_semantics<parallel>], iteration_bounds = array<i64: 1>, scalar_prefetch = 0 : i64, scratch_operands = 4 : i64, tpu.core_type = #tpu.core_type<tc>, window_params = [{transform_indices = @transform_0, window_bounds = array<i64: 2, 8, 4>}, {pipeline_mode = #tpu.pipeline_mode<synchronous>, transform_indices = @transform_1, window_bounds = array<i64: 4, 128>}, {pipeline_mode = #tpu.pipeline_mode<synchronous>, transform_indices = @transform_2, window_bounds = array<i64: 32, 128>}, {pipeline_mode = #tpu.pipeline_mode<synchronous>, transform_indices = @transform_3, window_bounds = array<i64: 1, 128>}, {pipeline_mode = #tpu.pipeline_mode<synchronous>, transform_indices = @transform_4, window_bounds = array<i64: 32, 128>}, {pipeline_mode = #tpu.pipeline_mode<synchronous>, transform_indices = @transform_5, window_bounds = array<i64: 32, 128>}, {pipeline_mode = #tpu.pipeline_mode<synchronous>, transform_indices = @transform_6, window_bounds = array<i64: 1, 128>}, {pipeline_mode = #tpu.pipeline_mode<synchronous>, transform_indices = @transform_7, window_bounds = array<i64: 32, 4>}, {pipeline_mode = #tpu.pipeline_mode<synchronous>, transform_indices = @transform_8, window_bounds = array<i64: 1, 4>}, {transform_indices = @transform_9, window_bounds = array<i64: 2, 4>}]} {
    %c0 = arith.constant 0 : index
    %c0_0 = arith.constant 0 : index
    %c0_1 = arith.constant 0 : index
    %0 = vector.load %arg1[%c0, %c0_0, %c0_1] : memref<2x8x4xf32, #tpu.memory_space<vmem>>, vector<1x8x4xf32>
    %1 = vector.shape_cast %0 : vector<1x8x4xf32> to vector<8x4xf32>
    %c0_2 = arith.constant 0 : index
    %c0_3 = arith.constant 0 : index
    %2 = vector.load %arg2[%c0_2, %c0_3] : memref<4x128xf32, #tpu.memory_space<vmem>>, vector<4x128xf32>
    %cst = arith.constant dense<0.000000e+00> : vector<8x128xf32>
    %3 = tpu.matmul %1, %2, %cst {dimension_numbers = #tpu.dot_dimension_numbers<[1], [0], [0], [1], [0, 0, 1, 1], [], []>} : vector<8x4xf32>, vector<4x128xf32>, vector<8x128xf32> -> vector<8x128xf32>
    %c0_4 = arith.constant 0 : index
    %c0_5 = arith.constant 0 : index
    %4 = vector.load %arg4[%c0_4, %c0_5] : memref<1x128xf32, #tpu.memory_space<vmem>>, vector<1x128xf32>
    %5 = vector.broadcast %4 : vector<1x128xf32> to vector<8x128xf32>
    %6 = arith.addf %3, %5 : vector<8x128xf32>
    %7 = vector.shape_cast %6 : vector<8x128xf32> to vector<8x1x128xf32>
    %c0_6 = arith.constant 0 : index
    %c0_7 = arith.constant 0 : index
    %c0_8 = arith.constant 0 : index
    %8 = vector.load %arg11[%c0_6, %c0_7, %c0_8] : memref<8x2x128xf32, #tpu.memory_space<vmem>>, vector<8x1x128xf32>
    tpu.vector_store %arg11[%c0_6, %c0_7, %c0_8], %7 {strides = array<i32>} : memref<8x2x128xf32, #tpu.memory_space<vmem>>, vector<8x1x128xf32>,
    %c1 = arith.constant 1 : index
    %c0_9 = arith.constant 0 : index
    %c0_10 = arith.constant 0 : index
    %9 = vector.load %arg1[%c1, %c0_9, %c0_10] : memref<2x8x4xf32, #tpu.memory_space<vmem>>, vector<1x8x4xf32>
    %10 = vector.shape_cast %9 : vector<1x8x4xf32> to vector<8x4xf32>
    %c0_11 = arith.constant 0 : index
    %c0_12 = arith.constant 0 : index
    %11 = vector.load %arg2[%c0_11, %c0_12] : memref<4x128xf32, #tpu.memory_space<vmem>>, vector<4x128xf32>
    %cst_13 = arith.constant dense<0.000000e+00> : vector<8x128xf32>
    %12 = tpu.matmul %10, %11, %cst_13 {dimension_numbers = #tpu.dot_dimension_numbers<[1], [0], [0], [1], [0, 0, 1, 1], [], []>} : vector<8x4xf32>, vector<4x128xf32>, vector<8x128xf32> -> vector<8x128xf32>
    %c0_14 = arith.constant 0 : index
    %c0_15 = arith.constant 0 : index
    %13 = vector.load %arg4[%c0_14, %c0_15] : memref<1x128xf32, #tpu.memory_space<vmem>>, vector<1x128xf32>
    %14 = vector.broadcast %13 : vector<1x128xf32> to vector<8x128xf32>
    %15 = arith.addf %12, %14 : vector<8x128xf32>
    %16 = vector.shape_cast %15 : vector<8x128xf32> to vector<8x1x128xf32>
    %c0_16 = arith.constant 0 : index
    %c1_17 = arith.constant 1 : index
    %c0_18 = arith.constant 0 : index
    %17 = vector.load %arg11[%c0_16, %c1_17, %c0_18] : memref<8x2x128xf32, #tpu.memory_space<vmem>>, vector<8x1x128xf32>
    tpu.vector_store %arg11[%c0_16, %c1_17, %c0_18], %16 {strides = array<i32>} : memref<8x2x128xf32, #tpu.memory_space<vmem>>, vector<8x1x128xf32>,
    %cst_19 = arith.constant 0.000000e+00 : f32
    %18 = vector.broadcast %cst_19 : f32 to vector<2x32xf32>
    %c0_20 = arith.constant 0 : index
    %c0_21 = arith.constant 0 : index
    %19 = vector.load %arg13[%c0_20, %c0_21] : memref<2x32xf32, #tpu.memory_space<vmem>>, vector<2x32xf32>
    tpu.vector_store %arg13[%c0_20, %c0_21], %18 {strides = array<i32>} : memref<2x32xf32, #tpu.memory_space<vmem>>, vector<2x32xf32>,
    %cst_22 = arith.constant 0.000000e+00 : f32
    %20 = vector.broadcast %cst_22 : f32 to vector<2x32xf32>
    %c0_23 = arith.constant 0 : index
    %c0_24 = arith.constant 0 : index
    %21 = vector.load %arg14[%c0_23, %c0_24] : memref<2x32xf32, #tpu.memory_space<vmem>>, vector<2x32xf32>
    tpu.vector_store %arg14[%c0_23, %c0_24], %20 {strides = array<i32>} : memref<2x32xf32, #tpu.memory_space<vmem>>, vector<2x32xf32>,
    %c0_i32 = arith.constant 0 : i32
    %22 = arith.index_cast %c0_i32 : i32 to index
    %c0_25 = arith.constant 0 : index
    %c0_26 = arith.constant 0 : index
    %23 = vector.load %arg11[%22, %c0_25, %c0_26] : memref<8x2x128xf32, #tpu.memory_space<vmem>>, vector<1x2x128xf32>
    %24 = vector.shape_cast %23 : vector<1x2x128xf32> to vector<2x128xf32>
    %c0_27 = arith.constant 0 : index
    %c0_28 = arith.constant 0 : index
    %25 = vector.load %arg13[%c0_27, %c0_28] : memref<2x32xf32, #tpu.memory_space<vmem>>, vector<2x32xf32>
    %c0_29 = arith.constant 0 : index
    %c0_30 = arith.constant 0 : index
    %26 = vector.load %arg3[%c0_29, %c0_30] : memref<32x128xf32, #tpu.memory_space<vmem>>, vector<32x128xf32>
    %cst_31 = arith.constant dense<0.000000e+00> : vector<2x128xf32>
    %27 = tpu.matmul %25, %26, %cst_31 {dimension_numbers = #tpu.dot_dimension_numbers<[1], [0], [0], [1], [0, 0, 1, 1], [], []>} : vector<2x32xf32>, vector<32x128xf32>, vector<2x128xf32> -> vector<2x128xf32>
    %28 = arith.addf %24, %27 : vector<2x128xf32>
    %29 = vector.extract_strided_slice %28 {offsets = [0, 0], sizes = [2, 96], strides = [1, 1]} : vector<2x128xf32> to vector<2x96xf32>
    %30 = arith.negf %29 : vector<2x96xf32>
    %31 = math.exp %30 : vector<2x96xf32>
    %cst_32 = arith.constant 1.000000e+00 : f32
    %32 = vector.broadcast %cst_32 : f32 to vector<2x96xf32>
    %33 = arith.addf %32, %31 : vector<2x96xf32>
    %34 = arith.divf %32, %33 : vector<2x96xf32>
    %35 = vector.extract_strided_slice %28 {offsets = [0, 96], sizes = [2, 32], strides = [1, 1]} : vector<2x128xf32> to vector<2x32xf32>
    %36 = math.tanh %35 : vector<2x32xf32>
    %37 = vector.extract_strided_slice %34 {offsets = [0, 0], sizes = [2, 32], strides = [1, 1]} : vector<2x96xf32> to vector<2x32xf32>
    %38 = vector.extract_strided_slice %34 {offsets = [0, 32], sizes = [2, 32], strides = [1, 1]} : vector<2x96xf32> to vector<2x32xf32>
    %39 = vector.extract_strided_slice %34 {offsets = [0, 64], sizes = [2, 32], strides = [1, 1]} : vector<2x96xf32> to vector<2x32xf32>
    %c0_33 = arith.constant 0 : index
    %c0_34 = arith.constant 0 : index
    %40 = vector.load %arg14[%c0_33, %c0_34] : memref<2x32xf32, #tpu.memory_space<vmem>>, vector<2x32xf32>
    %41 = arith.mulf %38, %40 : vector<2x32xf32>
    %42 = arith.mulf %37, %36 : vector<2x32xf32>
    %43 = arith.addf %41, %42 : vector<2x32xf32>
    %44 = math.tanh %43 : vector<2x32xf32>
    %45 = arith.mulf %39, %44 : vector<2x32xf32>
    %c0_35 = arith.constant 0 : index
    %c0_36 = arith.constant 0 : index
    %46 = vector.load %arg14[%c0_35, %c0_36] : memref<2x32xf32, #tpu.memory_space<vmem>>, vector<2x32xf32>
    tpu.vector_store %arg14[%c0_35, %c0_36], %43 {strides = array<i32>} : memref<2x32xf32, #tpu.memory_space<vmem>>, vector<2x32xf32>,
    %c0_37 = arith.constant 0 : index
    %c0_38 = arith.constant 0 : index
    %47 = vector.load %arg13[%c0_37, %c0_38] : memref<2x32xf32, #tpu.memory_space<vmem>>, vector<2x32xf32>
    tpu.vector_store %arg13[%c0_37, %c0_38], %45 {strides = array<i32>} : memref<2x32xf32, #tpu.memory_space<vmem>>, vector<2x32xf32>,
    %48 = arith.index_cast %c0_i32 : i32 to index
    %c0_39 = arith.constant 0 : index
    %c0_40 = arith.constant 0 : index
    %49 = vector.load %arg12[%48, %c0_39, %c0_40] : memref<8x2x32xf32, #tpu.memory_space<vmem>>, vector<1x2x32xf32>
    %50 = vector.shape_cast %49 : vector<1x2x32xf32> to vector<2x32xf32>
    %51 = vector.shape_cast %45 : vector<2x32xf32> to vector<1x2x32xf32>
    tpu.vector_store %arg12[%48, %c0_39, %c0_40], %51 {strides = array<i32>} : memref<8x2x32xf32, #tpu.memory_space<vmem>>, vector<1x2x32xf32>,
    %c1_i32 = arith.constant 1 : i32
    %52 = arith.index_cast %c1_i32 : i32 to index
    %c0_41 = arith.constant 0 : index
    %c0_42 = arith.constant 0 : index
    %53 = vector.load %arg11[%52, %c0_41, %c0_42] : memref<8x2x128xf32, #tpu.memory_space<vmem>>, vector<1x2x128xf32>
    %54 = vector.shape_cast %53 : vector<1x2x128xf32> to vector<2x128xf32>
    %c0_43 = arith.constant 0 : index
    %c0_44 = arith.constant 0 : index
    %55 = vector.load %arg13[%c0_43, %c0_44] : memref<2x32xf32, #tpu.memory_space<vmem>>, vector<2x32xf32>
    %c0_45 = arith.constant 0 : index
    %c0_46 = arith.constant 0 : index
    %56 = vector.load %arg3[%c0_45, %c0_46] : memref<32x128xf32, #tpu.memory_space<vmem>>, vector<32x128xf32>
    %cst_47 = arith.constant dense<0.000000e+00> : vector<2x128xf32>
    %57 = tpu.matmul %55, %56, %cst_47 {dimension_numbers = #tpu.dot_dimension_numbers<[1], [0], [0], [1], [0, 0, 1, 1], [], []>} : vector<2x32xf32>, vector<32x128xf32>, vector<2x128xf32> -> vector<2x128xf32>
    %58 = arith.addf %54, %57 : vector<2x128xf32>
    %59 = vector.extract_strided_slice %58 {offsets = [0, 0], sizes = [2, 96], strides = [1, 1]} : vector<2x128xf32> to vector<2x96xf32>
    %60 = arith.negf %59 : vector<2x96xf32>
    %61 = math.exp %60 : vector<2x96xf32>
    %cst_48 = arith.constant 1.000000e+00 : f32
    %62 = vector.broadcast %cst_48 : f32 to vector<2x96xf32>
    %63 = arith.addf %62, %61 : vector<2x96xf32>
    %64 = arith.divf %62, %63 : vector<2x96xf32>
    %65 = vector.extract_strided_slice %58 {offsets = [0, 96], sizes = [2, 32], strides = [1, 1]} : vector<2x128xf32> to vector<2x32xf32>
    %66 = math.tanh %65 : vector<2x32xf32>
    %67 = vector.extract_strided_slice %64 {offsets = [0, 0], sizes = [2, 32], strides = [1, 1]} : vector<2x96xf32> to vector<2x32xf32>
    %68 = vector.extract_strided_slice %64 {offsets = [0, 32], sizes = [2, 32], strides = [1, 1]} : vector<2x96xf32> to vector<2x32xf32>
    %69 = vector.extract_strided_slice %64 {offsets = [0, 64], sizes = [2, 32], strides = [1, 1]} : vector<2x96xf32> to vector<2x32xf32>
    %c0_49 = arith.constant 0 : index
    %c0_50 = arith.constant 0 : index
    %70 = vector.load %arg14[%c0_49, %c0_50] : memref<2x32xf32, #tpu.memory_space<vmem>>, vector<2x32xf32>
    %71 = arith.mulf %68, %70 : vector<2x32xf32>
    %72 = arith.mulf %67, %66 : vector<2x32xf32>
    %73 = arith.addf %71, %72 : vector<2x32xf32>
    %74 = math.tanh %73 : vector<2x32xf32>
    %75 = arith.mulf %69, %74 : vector<2x32xf32>
    %c0_51 = arith.constant 0 : index
    %c0_52 = arith.constant 0 : index
    %76 = vector.load %arg14[%c0_51, %c0_52] : memref<2x32xf32, #tpu.memory_space<vmem>>, vector<2x32xf32>
    tpu.vector_store %arg14[%c0_51, %c0_52], %73 {strides = array<i32>} : memref<2x32xf32, #tpu.memory_space<vmem>>, vector<2x32xf32>,
    %c0_53 = arith.constant 0 : index
    %c0_54 = arith.constant 0 : index
    %77 = vector.load %arg13[%c0_53, %c0_54] : memref<2x32xf32, #tpu.memory_space<vmem>>, vector<2x32xf32>
    tpu.vector_store %arg13[%c0_53, %c0_54], %75 {strides = array<i32>} : memref<2x32xf32, #tpu.memory_space<vmem>>, vector<2x32xf32>,
    %78 = arith.index_cast %c1_i32 : i32 to index
    %c0_55 = arith.constant 0 : index
    %c0_56 = arith.constant 0 : index
    %79 = vector.load %arg12[%78, %c0_55, %c0_56] : memref<8x2x32xf32, #tpu.memory_space<vmem>>, vector<1x2x32xf32>
    %80 = vector.shape_cast %79 : vector<1x2x32xf32> to vector<2x32xf32>
    %81 = vector.shape_cast %75 : vector<2x32xf32> to vector<1x2x32xf32>
    tpu.vector_store %arg12[%78, %c0_55, %c0_56], %81 {strides = array<i32>} : memref<8x2x32xf32, #tpu.memory_space<vmem>>, vector<1x2x32xf32>,
    %c2_i32 = arith.constant 2 : i32
    %82 = arith.index_cast %c2_i32 : i32 to index
    %c0_57 = arith.constant 0 : index
    %c0_58 = arith.constant 0 : index
    %83 = vector.load %arg11[%82, %c0_57, %c0_58] : memref<8x2x128xf32, #tpu.memory_space<vmem>>, vector<1x2x128xf32>
    %84 = vector.shape_cast %83 : vector<1x2x128xf32> to vector<2x128xf32>
    %c0_59 = arith.constant 0 : index
    %c0_60 = arith.constant 0 : index
    %85 = vector.load %arg13[%c0_59, %c0_60] : memref<2x32xf32, #tpu.memory_space<vmem>>, vector<2x32xf32>
    %c0_61 = arith.constant 0 : index
    %c0_62 = arith.constant 0 : index
    %86 = vector.load %arg3[%c0_61, %c0_62] : memref<32x128xf32, #tpu.memory_space<vmem>>, vector<32x128xf32>
    %cst_63 = arith.constant dense<0.000000e+00> : vector<2x128xf32>
    %87 = tpu.matmul %85, %86, %cst_63 {dimension_numbers = #tpu.dot_dimension_numbers<[1], [0], [0], [1], [0, 0, 1, 1], [], []>} : vector<2x32xf32>, vector<32x128xf32>, vector<2x128xf32> -> vector<2x128xf32>
    %88 = arith.addf %84, %87 : vector<2x128xf32>
    %89 = vector.extract_strided_slice %88 {offsets = [0, 0], sizes = [2, 96], strides = [1, 1]} : vector<2x128xf32> to vector<2x96xf32>
    %90 = arith.negf %89 : vector<2x96xf32>
    %91 = math.exp %90 : vector<2x96xf32>
    %cst_64 = arith.constant 1.000000e+00 : f32
    %92 = vector.broadcast %cst_64 : f32 to vector<2x96xf32>
    %93 = arith.addf %92, %91 : vector<2x96xf32>
    %94 = arith.divf %92, %93 : vector<2x96xf32>
    %95 = vector.extract_strided_slice %88 {offsets = [0, 96], sizes = [2, 32], strides = [1, 1]} : vector<2x128xf32> to vector<2x32xf32>
    %96 = math.tanh %95 : vector<2x32xf32>
    %97 = vector.extract_strided_slice %94 {offsets = [0, 0], sizes = [2, 32], strides = [1, 1]} : vector<2x96xf32> to vector<2x32xf32>
    %98 = vector.extract_strided_slice %94 {offsets = [0, 32], sizes = [2, 32], strides = [1, 1]} : vector<2x96xf32> to vector<2x32xf32>
    %99 = vector.extract_strided_slice %94 {offsets = [0, 64], sizes = [2, 32], strides = [1, 1]} : vector<2x96xf32> to vector<2x32xf32>
    %c0_65 = arith.constant 0 : index
    %c0_66 = arith.constant 0 : index
    %100 = vector.load %arg14[%c0_65, %c0_66] : memref<2x32xf32, #tpu.memory_space<vmem>>, vector<2x32xf32>
    %101 = arith.mulf %98, %100 : vector<2x32xf32>
    %102 = arith.mulf %97, %96 : vector<2x32xf32>
    %103 = arith.addf %101, %102 : vector<2x32xf32>
    %104 = math.tanh %103 : vector<2x32xf32>
    %105 = arith.mulf %99, %104 : vector<2x32xf32>
    %c0_67 = arith.constant 0 : index
    %c0_68 = arith.constant 0 : index
    %106 = vector.load %arg14[%c0_67, %c0_68] : memref<2x32xf32, #tpu.memory_space<vmem>>, vector<2x32xf32>
    tpu.vector_store %arg14[%c0_67, %c0_68], %103 {strides = array<i32>} : memref<2x32xf32, #tpu.memory_space<vmem>>, vector<2x32xf32>,
    %c0_69 = arith.constant 0 : index
    %c0_70 = arith.constant 0 : index
    %107 = vector.load %arg13[%c0_69, %c0_70] : memref<2x32xf32, #tpu.memory_space<vmem>>, vector<2x32xf32>
    tpu.vector_store %arg13[%c0_69, %c0_70], %105 {strides = array<i32>} : memref<2x32xf32, #tpu.memory_space<vmem>>, vector<2x32xf32>,
    %108 = arith.index_cast %c2_i32 : i32 to index
    %c0_71 = arith.constant 0 : index
    %c0_72 = arith.constant 0 : index
    %109 = vector.load %arg12[%108, %c0_71, %c0_72] : memref<8x2x32xf32, #tpu.memory_space<vmem>>, vector<1x2x32xf32>
    %110 = vector.shape_cast %109 : vector<1x2x32xf32> to vector<2x32xf32>
    %111 = vector.shape_cast %105 : vector<2x32xf32> to vector<1x2x32xf32>
    tpu.vector_store %arg12[%108, %c0_71, %c0_72], %111 {strides = array<i32>} : memref<8x2x32xf32, #tpu.memory_space<vmem>>, vector<1x2x32xf32>,
    %c3_i32 = arith.constant 3 : i32
    %112 = arith.index_cast %c3_i32 : i32 to index
    %c0_73 = arith.constant 0 : index
    %c0_74 = arith.constant 0 : index
    %113 = vector.load %arg11[%112, %c0_73, %c0_74] : memref<8x2x128xf32, #tpu.memory_space<vmem>>, vector<1x2x128xf32>
    %114 = vector.shape_cast %113 : vector<1x2x128xf32> to vector<2x128xf32>
    %c0_75 = arith.constant 0 : index
    %c0_76 = arith.constant 0 : index
    %115 = vector.load %arg13[%c0_75, %c0_76] : memref<2x32xf32, #tpu.memory_space<vmem>>, vector<2x32xf32>
    %c0_77 = arith.constant 0 : index
    %c0_78 = arith.constant 0 : index
    %116 = vector.load %arg3[%c0_77, %c0_78] : memref<32x128xf32, #tpu.memory_space<vmem>>, vector<32x128xf32>
    %cst_79 = arith.constant dense<0.000000e+00> : vector<2x128xf32>
    %117 = tpu.matmul %115, %116, %cst_79 {dimension_numbers = #tpu.dot_dimension_numbers<[1], [0], [0], [1], [0, 0, 1, 1], [], []>} : vector<2x32xf32>, vector<32x128xf32>, vector<2x128xf32> -> vector<2x128xf32>
    %118 = arith.addf %114, %117 : vector<2x128xf32>
    %119 = vector.extract_strided_slice %118 {offsets = [0, 0], sizes = [2, 96], strides = [1, 1]} : vector<2x128xf32> to vector<2x96xf32>
    %120 = arith.negf %119 : vector<2x96xf32>
    %121 = math.exp %120 : vector<2x96xf32>
    %cst_80 = arith.constant 1.000000e+00 : f32
    %122 = vector.broadcast %cst_80 : f32 to vector<2x96xf32>
    %123 = arith.addf %122, %121 : vector<2x96xf32>
    %124 = arith.divf %122, %123 : vector<2x96xf32>
    %125 = vector.extract_strided_slice %118 {offsets = [0, 96], sizes = [2, 32], strides = [1, 1]} : vector<2x128xf32> to vector<2x32xf32>
    %126 = math.tanh %125 : vector<2x32xf32>
    %127 = vector.extract_strided_slice %124 {offsets = [0, 0], sizes = [2, 32], strides = [1, 1]} : vector<2x96xf32> to vector<2x32xf32>
    %128 = vector.extract_strided_slice %124 {offsets = [0, 32], sizes = [2, 32], strides = [1, 1]} : vector<2x96xf32> to vector<2x32xf32>
    %129 = vector.extract_strided_slice %124 {offsets = [0, 64], sizes = [2, 32], strides = [1, 1]} : vector<2x96xf32> to vector<2x32xf32>
    %c0_81 = arith.constant 0 : index
    %c0_82 = arith.constant 0 : index
    %130 = vector.load %arg14[%c0_81, %c0_82] : memref<2x32xf32, #tpu.memory_space<vmem>>, vector<2x32xf32>
    %131 = arith.mulf %128, %130 : vector<2x32xf32>
    %132 = arith.mulf %127, %126 : vector<2x32xf32>
    %133 = arith.addf %131, %132 : vector<2x32xf32>
    %134 = math.tanh %133 : vector<2x32xf32>
    %135 = arith.mulf %129, %134 : vector<2x32xf32>
    %c0_83 = arith.constant 0 : index
    %c0_84 = arith.constant 0 : index
    %136 = vector.load %arg14[%c0_83, %c0_84] : memref<2x32xf32, #tpu.memory_space<vmem>>, vector<2x32xf32>
    tpu.vector_store %arg14[%c0_83, %c0_84], %133 {strides = array<i32>} : memref<2x32xf32, #tpu.memory_space<vmem>>, vector<2x32xf32>,
    %c0_85 = arith.constant 0 : index
    %c0_86 = arith.constant 0 : index
    %137 = vector.load %arg13[%c0_85, %c0_86] : memref<2x32xf32, #tpu.memory_space<vmem>>, vector<2x32xf32>
    tpu.vector_store %arg13[%c0_85, %c0_86], %135 {strides = array<i32>} : memref<2x32xf32, #tpu.memory_space<vmem>>, vector<2x32xf32>,
    %138 = arith.index_cast %c3_i32 : i32 to index
    %c0_87 = arith.constant 0 : index
    %c0_88 = arith.constant 0 : index
    %139 = vector.load %arg12[%138, %c0_87, %c0_88] : memref<8x2x32xf32, #tpu.memory_space<vmem>>, vector<1x2x32xf32>
    %140 = vector.shape_cast %139 : vector<1x2x32xf32> to vector<2x32xf32>
    %141 = vector.shape_cast %135 : vector<2x32xf32> to vector<1x2x32xf32>
    tpu.vector_store %arg12[%138, %c0_87, %c0_88], %141 {strides = array<i32>} : memref<8x2x32xf32, #tpu.memory_space<vmem>>, vector<1x2x32xf32>,
    %c4_i32 = arith.constant 4 : i32
    %142 = arith.index_cast %c4_i32 : i32 to index
    %c0_89 = arith.constant 0 : index
    %c0_90 = arith.constant 0 : index
    %143 = vector.load %arg11[%142, %c0_89, %c0_90] : memref<8x2x128xf32, #tpu.memory_space<vmem>>, vector<1x2x128xf32>
    %144 = vector.shape_cast %143 : vector<1x2x128xf32> to vector<2x128xf32>
    %c0_91 = arith.constant 0 : index
    %c0_92 = arith.constant 0 : index
    %145 = vector.load %arg13[%c0_91, %c0_92] : memref<2x32xf32, #tpu.memory_space<vmem>>, vector<2x32xf32>
    %c0_93 = arith.constant 0 : index
    %c0_94 = arith.constant 0 : index
    %146 = vector.load %arg3[%c0_93, %c0_94] : memref<32x128xf32, #tpu.memory_space<vmem>>, vector<32x128xf32>
    %cst_95 = arith.constant dense<0.000000e+00> : vector<2x128xf32>
    %147 = tpu.matmul %145, %146, %cst_95 {dimension_numbers = #tpu.dot_dimension_numbers<[1], [0], [0], [1], [0, 0, 1, 1], [], []>} : vector<2x32xf32>, vector<32x128xf32>, vector<2x128xf32> -> vector<2x128xf32>
    %148 = arith.addf %144, %147 : vector<2x128xf32>
    %149 = vector.extract_strided_slice %148 {offsets = [0, 0], sizes = [2, 96], strides = [1, 1]} : vector<2x128xf32> to vector<2x96xf32>
    %150 = arith.negf %149 : vector<2x96xf32>
    %151 = math.exp %150 : vector<2x96xf32>
    %cst_96 = arith.constant 1.000000e+00 : f32
    %152 = vector.broadcast %cst_96 : f32 to vector<2x96xf32>
    %153 = arith.addf %152, %151 : vector<2x96xf32>
    %154 = arith.divf %152, %153 : vector<2x96xf32>
    %155 = vector.extract_strided_slice %148 {offsets = [0, 96], sizes = [2, 32], strides = [1, 1]} : vector<2x128xf32> to vector<2x32xf32>
    %156 = math.tanh %155 : vector<2x32xf32>
    %157 = vector.extract_strided_slice %154 {offsets = [0, 0], sizes = [2, 32], strides = [1, 1]} : vector<2x96xf32> to vector<2x32xf32>
    %158 = vector.extract_strided_slice %154 {offsets = [0, 32], sizes = [2, 32], strides = [1, 1]} : vector<2x96xf32> to vector<2x32xf32>
    %159 = vector.extract_strided_slice %154 {offsets = [0, 64], sizes = [2, 32], strides = [1, 1]} : vector<2x96xf32> to vector<2x32xf32>
    %c0_97 = arith.constant 0 : index
    %c0_98 = arith.constant 0 : index
    %160 = vector.load %arg14[%c0_97, %c0_98] : memref<2x32xf32, #tpu.memory_space<vmem>>, vector<2x32xf32>
    %161 = arith.mulf %158, %160 : vector<2x32xf32>
    %162 = arith.mulf %157, %156 : vector<2x32xf32>
    %163 = arith.addf %161, %162 : vector<2x32xf32>
    %164 = math.tanh %163 : vector<2x32xf32>
    %165 = arith.mulf %159, %164 : vector<2x32xf32>
    %c0_99 = arith.constant 0 : index
    %c0_100 = arith.constant 0 : index
    %166 = vector.load %arg14[%c0_99, %c0_100] : memref<2x32xf32, #tpu.memory_space<vmem>>, vector<2x32xf32>
    tpu.vector_store %arg14[%c0_99, %c0_100], %163 {strides = array<i32>} : memref<2x32xf32, #tpu.memory_space<vmem>>, vector<2x32xf32>,
    %c0_101 = arith.constant 0 : index
    %c0_102 = arith.constant 0 : index
    %167 = vector.load %arg13[%c0_101, %c0_102] : memref<2x32xf32, #tpu.memory_space<vmem>>, vector<2x32xf32>
    tpu.vector_store %arg13[%c0_101, %c0_102], %165 {strides = array<i32>} : memref<2x32xf32, #tpu.memory_space<vmem>>, vector<2x32xf32>,
    %168 = arith.index_cast %c4_i32 : i32 to index
    %c0_103 = arith.constant 0 : index
    %c0_104 = arith.constant 0 : index
    %169 = vector.load %arg12[%168, %c0_103, %c0_104] : memref<8x2x32xf32, #tpu.memory_space<vmem>>, vector<1x2x32xf32>
    %170 = vector.shape_cast %169 : vector<1x2x32xf32> to vector<2x32xf32>
    %171 = vector.shape_cast %165 : vector<2x32xf32> to vector<1x2x32xf32>
    tpu.vector_store %arg12[%168, %c0_103, %c0_104], %171 {strides = array<i32>} : memref<8x2x32xf32, #tpu.memory_space<vmem>>, vector<1x2x32xf32>,
    %c5_i32 = arith.constant 5 : i32
    %172 = arith.index_cast %c5_i32 : i32 to index
    %c0_105 = arith.constant 0 : index
    %c0_106 = arith.constant 0 : index
    %173 = vector.load %arg11[%172, %c0_105, %c0_106] : memref<8x2x128xf32, #tpu.memory_space<vmem>>, vector<1x2x128xf32>
    %174 = vector.shape_cast %173 : vector<1x2x128xf32> to vector<2x128xf32>
    %c0_107 = arith.constant 0 : index
    %c0_108 = arith.constant 0 : index
    %175 = vector.load %arg13[%c0_107, %c0_108] : memref<2x32xf32, #tpu.memory_space<vmem>>, vector<2x32xf32>
    %c0_109 = arith.constant 0 : index
    %c0_110 = arith.constant 0 : index
    %176 = vector.load %arg3[%c0_109, %c0_110] : memref<32x128xf32, #tpu.memory_space<vmem>>, vector<32x128xf32>
    %cst_111 = arith.constant dense<0.000000e+00> : vector<2x128xf32>
    %177 = tpu.matmul %175, %176, %cst_111 {dimension_numbers = #tpu.dot_dimension_numbers<[1], [0], [0], [1], [0, 0, 1, 1], [], []>} : vector<2x32xf32>, vector<32x128xf32>, vector<2x128xf32> -> vector<2x128xf32>
    %178 = arith.addf %174, %177 : vector<2x128xf32>
    %179 = vector.extract_strided_slice %178 {offsets = [0, 0], sizes = [2, 96], strides = [1, 1]} : vector<2x128xf32> to vector<2x96xf32>
    %180 = arith.negf %179 : vector<2x96xf32>
    %181 = math.exp %180 : vector<2x96xf32>
    %cst_112 = arith.constant 1.000000e+00 : f32
    %182 = vector.broadcast %cst_112 : f32 to vector<2x96xf32>
    %183 = arith.addf %182, %181 : vector<2x96xf32>
    %184 = arith.divf %182, %183 : vector<2x96xf32>
    %185 = vector.extract_strided_slice %178 {offsets = [0, 96], sizes = [2, 32], strides = [1, 1]} : vector<2x128xf32> to vector<2x32xf32>
    %186 = math.tanh %185 : vector<2x32xf32>
    %187 = vector.extract_strided_slice %184 {offsets = [0, 0], sizes = [2, 32], strides = [1, 1]} : vector<2x96xf32> to vector<2x32xf32>
    %188 = vector.extract_strided_slice %184 {offsets = [0, 32], sizes = [2, 32], strides = [1, 1]} : vector<2x96xf32> to vector<2x32xf32>
    %189 = vector.extract_strided_slice %184 {offsets = [0, 64], sizes = [2, 32], strides = [1, 1]} : vector<2x96xf32> to vector<2x32xf32>
    %c0_113 = arith.constant 0 : index
    %c0_114 = arith.constant 0 : index
    %190 = vector.load %arg14[%c0_113, %c0_114] : memref<2x32xf32, #tpu.memory_space<vmem>>, vector<2x32xf32>
    %191 = arith.mulf %188, %190 : vector<2x32xf32>
    %192 = arith.mulf %187, %186 : vector<2x32xf32>
    %193 = arith.addf %191, %192 : vector<2x32xf32>
    %194 = math.tanh %193 : vector<2x32xf32>
    %195 = arith.mulf %189, %194 : vector<2x32xf32>
    %c0_115 = arith.constant 0 : index
    %c0_116 = arith.constant 0 : index
    %196 = vector.load %arg14[%c0_115, %c0_116] : memref<2x32xf32, #tpu.memory_space<vmem>>, vector<2x32xf32>
    tpu.vector_store %arg14[%c0_115, %c0_116], %193 {strides = array<i32>} : memref<2x32xf32, #tpu.memory_space<vmem>>, vector<2x32xf32>,
    %c0_117 = arith.constant 0 : index
    %c0_118 = arith.constant 0 : index
    %197 = vector.load %arg13[%c0_117, %c0_118] : memref<2x32xf32, #tpu.memory_space<vmem>>, vector<2x32xf32>
    tpu.vector_store %arg13[%c0_117, %c0_118], %195 {strides = array<i32>} : memref<2x32xf32, #tpu.memory_space<vmem>>, vector<2x32xf32>,
    %198 = arith.index_cast %c5_i32 : i32 to index
    %c0_119 = arith.constant 0 : index
    %c0_120 = arith.constant 0 : index
    %199 = vector.load %arg12[%198, %c0_119, %c0_120] : memref<8x2x32xf32, #tpu.memory_space<vmem>>, vector<1x2x32xf32>
    %200 = vector.shape_cast %199 : vector<1x2x32xf32> to vector<2x32xf32>
    %201 = vector.shape_cast %195 : vector<2x32xf32> to vector<1x2x32xf32>
    tpu.vector_store %arg12[%198, %c0_119, %c0_120], %201 {strides = array<i32>} : memref<8x2x32xf32, #tpu.memory_space<vmem>>, vector<1x2x32xf32>,
    %c6_i32 = arith.constant 6 : i32
    %202 = arith.index_cast %c6_i32 : i32 to index
    %c0_121 = arith.constant 0 : index
    %c0_122 = arith.constant 0 : index
    %203 = vector.load %arg11[%202, %c0_121, %c0_122] : memref<8x2x128xf32, #tpu.memory_space<vmem>>, vector<1x2x128xf32>
    %204 = vector.shape_cast %203 : vector<1x2x128xf32> to vector<2x128xf32>
    %c0_123 = arith.constant 0 : index
    %c0_124 = arith.constant 0 : index
    %205 = vector.load %arg13[%c0_123, %c0_124] : memref<2x32xf32, #tpu.memory_space<vmem>>, vector<2x32xf32>
    %c0_125 = arith.constant 0 : index
    %c0_126 = arith.constant 0 : index
    %206 = vector.load %arg3[%c0_125, %c0_126] : memref<32x128xf32, #tpu.memory_space<vmem>>, vector<32x128xf32>
    %cst_127 = arith.constant dense<0.000000e+00> : vector<2x128xf32>
    %207 = tpu.matmul %205, %206, %cst_127 {dimension_numbers = #tpu.dot_dimension_numbers<[1], [0], [0], [1], [0, 0, 1, 1], [], []>} : vector<2x32xf32>, vector<32x128xf32>, vector<2x128xf32> -> vector<2x128xf32>
    %208 = arith.addf %204, %207 : vector<2x128xf32>
    %209 = vector.extract_strided_slice %208 {offsets = [0, 0], sizes = [2, 96], strides = [1, 1]} : vector<2x128xf32> to vector<2x96xf32>
    %210 = arith.negf %209 : vector<2x96xf32>
    %211 = math.exp %210 : vector<2x96xf32>
    %cst_128 = arith.constant 1.000000e+00 : f32
    %212 = vector.broadcast %cst_128 : f32 to vector<2x96xf32>
    %213 = arith.addf %212, %211 : vector<2x96xf32>
    %214 = arith.divf %212, %213 : vector<2x96xf32>
    %215 = vector.extract_strided_slice %208 {offsets = [0, 96], sizes = [2, 32], strides = [1, 1]} : vector<2x128xf32> to vector<2x32xf32>
    %216 = math.tanh %215 : vector<2x32xf32>
    %217 = vector.extract_strided_slice %214 {offsets = [0, 0], sizes = [2, 32], strides = [1, 1]} : vector<2x96xf32> to vector<2x32xf32>
    %218 = vector.extract_strided_slice %214 {offsets = [0, 32], sizes = [2, 32], strides = [1, 1]} : vector<2x96xf32> to vector<2x32xf32>
    %219 = vector.extract_strided_slice %214 {offsets = [0, 64], sizes = [2, 32], strides = [1, 1]} : vector<2x96xf32> to vector<2x32xf32>
    %c0_129 = arith.constant 0 : index
    %c0_130 = arith.constant 0 : index
    %220 = vector.load %arg14[%c0_129, %c0_130] : memref<2x32xf32, #tpu.memory_space<vmem>>, vector<2x32xf32>
    %221 = arith.mulf %218, %220 : vector<2x32xf32>
    %222 = arith.mulf %217, %216 : vector<2x32xf32>
    %223 = arith.addf %221, %222 : vector<2x32xf32>
    %224 = math.tanh %223 : vector<2x32xf32>
    %225 = arith.mulf %219, %224 : vector<2x32xf32>
    %c0_131 = arith.constant 0 : index
    %c0_132 = arith.constant 0 : index
    %226 = vector.load %arg14[%c0_131, %c0_132] : memref<2x32xf32, #tpu.memory_space<vmem>>, vector<2x32xf32>
    tpu.vector_store %arg14[%c0_131, %c0_132], %223 {strides = array<i32>} : memref<2x32xf32, #tpu.memory_space<vmem>>, vector<2x32xf32>,
    %c0_133 = arith.constant 0 : index
    %c0_134 = arith.constant 0 : index
    %227 = vector.load %arg13[%c0_133, %c0_134] : memref<2x32xf32, #tpu.memory_space<vmem>>, vector<2x32xf32>
    tpu.vector_store %arg13[%c0_133, %c0_134], %225 {strides = array<i32>} : memref<2x32xf32, #tpu.memory_space<vmem>>, vector<2x32xf32>,
    %228 = arith.index_cast %c6_i32 : i32 to index
    %c0_135 = arith.constant 0 : index
    %c0_136 = arith.constant 0 : index
    %229 = vector.load %arg12[%228, %c0_135, %c0_136] : memref<8x2x32xf32, #tpu.memory_space<vmem>>, vector<1x2x32xf32>
    %230 = vector.shape_cast %229 : vector<1x2x32xf32> to vector<2x32xf32>
    %231 = vector.shape_cast %225 : vector<2x32xf32> to vector<1x2x32xf32>
    tpu.vector_store %arg12[%228, %c0_135, %c0_136], %231 {strides = array<i32>} : memref<8x2x32xf32, #tpu.memory_space<vmem>>, vector<1x2x32xf32>,
    %c7_i32 = arith.constant 7 : i32
    %232 = arith.index_cast %c7_i32 : i32 to index
    %c0_137 = arith.constant 0 : index
    %c0_138 = arith.constant 0 : index
    %233 = vector.load %arg11[%232, %c0_137, %c0_138] : memref<8x2x128xf32, #tpu.memory_space<vmem>>, vector<1x2x128xf32>
    %234 = vector.shape_cast %233 : vector<1x2x128xf32> to vector<2x128xf32>
    %c0_139 = arith.constant 0 : index
    %c0_140 = arith.constant 0 : index
    %235 = vector.load %arg13[%c0_139, %c0_140] : memref<2x32xf32, #tpu.memory_space<vmem>>, vector<2x32xf32>
    %c0_141 = arith.constant 0 : index
    %c0_142 = arith.constant 0 : index
    %236 = vector.load %arg3[%c0_141, %c0_142] : memref<32x128xf32, #tpu.memory_space<vmem>>, vector<32x128xf32>
    %cst_143 = arith.constant dense<0.000000e+00> : vector<2x128xf32>
    %237 = tpu.matmul %235, %236, %cst_143 {dimension_numbers = #tpu.dot_dimension_numbers<[1], [0], [0], [1], [0, 0, 1, 1], [], []>} : vector<2x32xf32>, vector<32x128xf32>, vector<2x128xf32> -> vector<2x128xf32>
    %238 = arith.addf %234, %237 : vector<2x128xf32>
    %239 = vector.extract_strided_slice %238 {offsets = [0, 0], sizes = [2, 96], strides = [1, 1]} : vector<2x128xf32> to vector<2x96xf32>
    %240 = arith.negf %239 : vector<2x96xf32>
    %241 = math.exp %240 : vector<2x96xf32>
    %cst_144 = arith.constant 1.000000e+00 : f32
    %242 = vector.broadcast %cst_144 : f32 to vector<2x96xf32>
    %243 = arith.addf %242, %241 : vector<2x96xf32>
    %244 = arith.divf %242, %243 : vector<2x96xf32>
    %245 = vector.extract_strided_slice %238 {offsets = [0, 96], sizes = [2, 32], strides = [1, 1]} : vector<2x128xf32> to vector<2x32xf32>
    %246 = math.tanh %245 : vector<2x32xf32>
    %247 = vector.extract_strided_slice %244 {offsets = [0, 0], sizes = [2, 32], strides = [1, 1]} : vector<2x96xf32> to vector<2x32xf32>
    %248 = vector.extract_strided_slice %244 {offsets = [0, 32], sizes = [2, 32], strides = [1, 1]} : vector<2x96xf32> to vector<2x32xf32>
    %249 = vector.extract_strided_slice %244 {offsets = [0, 64], sizes = [2, 32], strides = [1, 1]} : vector<2x96xf32> to vector<2x32xf32>
    %c0_145 = arith.constant 0 : index
    %c0_146 = arith.constant 0 : index
    %250 = vector.load %arg14[%c0_145, %c0_146] : memref<2x32xf32, #tpu.memory_space<vmem>>, vector<2x32xf32>
    %251 = arith.mulf %248, %250 : vector<2x32xf32>
    %252 = arith.mulf %247, %246 : vector<2x32xf32>
    %253 = arith.addf %251, %252 : vector<2x32xf32>
    %254 = math.tanh %253 : vector<2x32xf32>
    %255 = arith.mulf %249, %254 : vector<2x32xf32>
    %c0_147 = arith.constant 0 : index
    %c0_148 = arith.constant 0 : index
    %256 = vector.load %arg14[%c0_147, %c0_148] : memref<2x32xf32, #tpu.memory_space<vmem>>, vector<2x32xf32>
    tpu.vector_store %arg14[%c0_147, %c0_148], %253 {strides = array<i32>} : memref<2x32xf32, #tpu.memory_space<vmem>>, vector<2x32xf32>,
    %c0_149 = arith.constant 0 : index
    %c0_150 = arith.constant 0 : index
    %257 = vector.load %arg13[%c0_149, %c0_150] : memref<2x32xf32, #tpu.memory_space<vmem>>, vector<2x32xf32>
    tpu.vector_store %arg13[%c0_149, %c0_150], %255 {strides = array<i32>} : memref<2x32xf32, #tpu.memory_space<vmem>>, vector<2x32xf32>,
    %258 = arith.index_cast %c7_i32 : i32 to index
    %c0_151 = arith.constant 0 : index
    %c0_152 = arith.constant 0 : index
    %259 = vector.load %arg12[%258, %c0_151, %c0_152] : memref<8x2x32xf32, #tpu.memory_space<vmem>>, vector<1x2x32xf32>
    %260 = vector.shape_cast %259 : vector<1x2x32xf32> to vector<2x32xf32>
    %261 = vector.shape_cast %255 : vector<2x32xf32> to vector<1x2x32xf32>
    tpu.vector_store %arg12[%258, %c0_151, %c0_152], %261 {strides = array<i32>} : memref<8x2x32xf32, #tpu.memory_space<vmem>>, vector<1x2x32xf32>,
    %c8_i32 = arith.constant 8 : i32
    %c0_153 = arith.constant 0 : index
    %c0_154 = arith.constant 0 : index
    %c0_155 = arith.constant 0 : index
    %262 = vector.load %arg12[%c0_153, %c0_154, %c0_155] : memref<8x2x32xf32, #tpu.memory_space<vmem>>, vector<8x1x32xf32>
    %263 = vector.shape_cast %262 : vector<8x1x32xf32> to vector<8x32xf32>
    %c0_156 = arith.constant 0 : index
    %c0_157 = arith.constant 0 : index
    %264 = vector.load %arg5[%c0_156, %c0_157] : memref<32x128xf32, #tpu.memory_space<vmem>>, vector<32x128xf32>
    %cst_158 = arith.constant dense<0.000000e+00> : vector<8x128xf32>
    %265 = tpu.matmul %263, %264, %cst_158 {dimension_numbers = #tpu.dot_dimension_numbers<[1], [0], [0], [1], [0, 0, 1, 1], [], []>} : vector<8x32xf32>, vector<32x128xf32>, vector<8x128xf32> -> vector<8x128xf32>
    %c0_159 = arith.constant 0 : index
    %c0_160 = arith.constant 0 : index
    %266 = vector.load %arg7[%c0_159, %c0_160] : memref<1x128xf32, #tpu.memory_space<vmem>>, vector<1x128xf32>
    %267 = vector.broadcast %266 : vector<1x128xf32> to vector<8x128xf32>
    %268 = arith.addf %265, %267 : vector<8x128xf32>
    %269 = vector.shape_cast %268 : vector<8x128xf32> to vector<8x1x128xf32>
    %c0_161 = arith.constant 0 : index
    %c0_162 = arith.constant 0 : index
    %c0_163 = arith.constant 0 : index
    %270 = vector.load %arg11[%c0_161, %c0_162, %c0_163] : memref<8x2x128xf32, #tpu.memory_space<vmem>>, vector<8x1x128xf32>
    tpu.vector_store %arg11[%c0_161, %c0_162, %c0_163], %269 {strides = array<i32>} : memref<8x2x128xf32, #tpu.memory_space<vmem>>, vector<8x1x128xf32>,
    %c0_164 = arith.constant 0 : index
    %c1_165 = arith.constant 1 : index
    %c0_166 = arith.constant 0 : index
    %271 = vector.load %arg12[%c0_164, %c1_165, %c0_166] : memref<8x2x32xf32, #tpu.memory_space<vmem>>, vector<8x1x32xf32>
    %272 = vector.shape_cast %271 : vector<8x1x32xf32> to vector<8x32xf32>
    %c0_167 = arith.constant 0 : index
    %c0_168 = arith.constant 0 : index
    %273 = vector.load %arg5[%c0_167, %c0_168] : memref<32x128xf32, #tpu.memory_space<vmem>>, vector<32x128xf32>
    %cst_169 = arith.constant dense<0.000000e+00> : vector<8x128xf32>
    %274 = tpu.matmul %272, %273, %cst_169 {dimension_numbers = #tpu.dot_dimension_numbers<[1], [0], [0], [1], [0, 0, 1, 1], [], []>} : vector<8x32xf32>, vector<32x128xf32>, vector<8x128xf32> -> vector<8x128xf32>
    %c0_170 = arith.constant 0 : index
    %c0_171 = arith.constant 0 : index
    %275 = vector.load %arg7[%c0_170, %c0_171] : memref<1x128xf32, #tpu.memory_space<vmem>>, vector<1x128xf32>
    %276 = vector.broadcast %275 : vector<1x128xf32> to vector<8x128xf32>
    %277 = arith.addf %274, %276 : vector<8x128xf32>
    %278 = vector.shape_cast %277 : vector<8x128xf32> to vector<8x1x128xf32>
    %c0_172 = arith.constant 0 : index
    %c1_173 = arith.constant 1 : index
    %c0_174 = arith.constant 0 : index
    %279 = vector.load %arg11[%c0_172, %c1_173, %c0_174] : memref<8x2x128xf32, #tpu.memory_space<vmem>>, vector<8x1x128xf32>
    tpu.vector_store %arg11[%c0_172, %c1_173, %c0_174], %278 {strides = array<i32>} : memref<8x2x128xf32, #tpu.memory_space<vmem>>, vector<8x1x128xf32>,
    %cst_175 = arith.constant 0.000000e+00 : f32
    %280 = vector.broadcast %cst_175 : f32 to vector<2x32xf32>
    %c0_176 = arith.constant 0 : index
    %c0_177 = arith.constant 0 : index
    %281 = vector.load %arg13[%c0_176, %c0_177] : memref<2x32xf32, #tpu.memory_space<vmem>>, vector<2x32xf32>
    tpu.vector_store %arg13[%c0_176, %c0_177], %280 {strides = array<i32>} : memref<2x32xf32, #tpu.memory_space<vmem>>, vector<2x32xf32>,
    %cst_178 = arith.constant 0.000000e+00 : f32
    %282 = vector.broadcast %cst_178 : f32 to vector<2x32xf32>
    %c0_179 = arith.constant 0 : index
    %c0_180 = arith.constant 0 : index
    %283 = vector.load %arg14[%c0_179, %c0_180] : memref<2x32xf32, #tpu.memory_space<vmem>>, vector<2x32xf32>
    tpu.vector_store %arg14[%c0_179, %c0_180], %282 {strides = array<i32>} : memref<2x32xf32, #tpu.memory_space<vmem>>, vector<2x32xf32>,
    %c0_i32_181 = arith.constant 0 : i32
    %284 = arith.index_cast %c0_i32_181 : i32 to index
    %c0_182 = arith.constant 0 : index
    %c0_183 = arith.constant 0 : index
    %285 = vector.load %arg11[%284, %c0_182, %c0_183] : memref<8x2x128xf32, #tpu.memory_space<vmem>>, vector<1x2x128xf32>
    %286 = vector.shape_cast %285 : vector<1x2x128xf32> to vector<2x128xf32>
    %c0_184 = arith.constant 0 : index
    %c0_185 = arith.constant 0 : index
    %287 = vector.load %arg13[%c0_184, %c0_185] : memref<2x32xf32, #tpu.memory_space<vmem>>, vector<2x32xf32>
    %c0_186 = arith.constant 0 : index
    %c0_187 = arith.constant 0 : index
    %288 = vector.load %arg6[%c0_186, %c0_187] : memref<32x128xf32, #tpu.memory_space<vmem>>, vector<32x128xf32>
    %cst_188 = arith.constant dense<0.000000e+00> : vector<2x128xf32>
    %289 = tpu.matmul %287, %288, %cst_188 {dimension_numbers = #tpu.dot_dimension_numbers<[1], [0], [0], [1], [0, 0, 1, 1], [], []>} : vector<2x32xf32>, vector<32x128xf32>, vector<2x128xf32> -> vector<2x128xf32>
    %290 = arith.addf %286, %289 : vector<2x128xf32>
    %291 = vector.extract_strided_slice %290 {offsets = [0, 0], sizes = [2, 96], strides = [1, 1]} : vector<2x128xf32> to vector<2x96xf32>
    %292 = arith.negf %291 : vector<2x96xf32>
    %293 = math.exp %292 : vector<2x96xf32>
    %cst_189 = arith.constant 1.000000e+00 : f32
    %294 = vector.broadcast %cst_189 : f32 to vector<2x96xf32>
    %295 = arith.addf %294, %293 : vector<2x96xf32>
    %296 = arith.divf %294, %295 : vector<2x96xf32>
    %297 = vector.extract_strided_slice %290 {offsets = [0, 96], sizes = [2, 32], strides = [1, 1]} : vector<2x128xf32> to vector<2x32xf32>
    %298 = math.tanh %297 : vector<2x32xf32>
    %299 = vector.extract_strided_slice %296 {offsets = [0, 0], sizes = [2, 32], strides = [1, 1]} : vector<2x96xf32> to vector<2x32xf32>
    %300 = vector.extract_strided_slice %296 {offsets = [0, 32], sizes = [2, 32], strides = [1, 1]} : vector<2x96xf32> to vector<2x32xf32>
    %301 = vector.extract_strided_slice %296 {offsets = [0, 64], sizes = [2, 32], strides = [1, 1]} : vector<2x96xf32> to vector<2x32xf32>
    %c0_190 = arith.constant 0 : index
    %c0_191 = arith.constant 0 : index
    %302 = vector.load %arg14[%c0_190, %c0_191] : memref<2x32xf32, #tpu.memory_space<vmem>>, vector<2x32xf32>
    %303 = arith.mulf %300, %302 : vector<2x32xf32>
    %304 = arith.mulf %299, %298 : vector<2x32xf32>
    %305 = arith.addf %303, %304 : vector<2x32xf32>
    %306 = math.tanh %305 : vector<2x32xf32>
    %307 = arith.mulf %301, %306 : vector<2x32xf32>
    %c0_192 = arith.constant 0 : index
    %c0_193 = arith.constant 0 : index
    %308 = vector.load %arg14[%c0_192, %c0_193] : memref<2x32xf32, #tpu.memory_space<vmem>>, vector<2x32xf32>
    tpu.vector_store %arg14[%c0_192, %c0_193], %305 {strides = array<i32>} : memref<2x32xf32, #tpu.memory_space<vmem>>, vector<2x32xf32>,
    %c0_194 = arith.constant 0 : index
    %c0_195 = arith.constant 0 : index
    %309 = vector.load %arg13[%c0_194, %c0_195] : memref<2x32xf32, #tpu.memory_space<vmem>>, vector<2x32xf32>
    tpu.vector_store %arg13[%c0_194, %c0_195], %307 {strides = array<i32>} : memref<2x32xf32, #tpu.memory_space<vmem>>, vector<2x32xf32>,
    %c1_i32_196 = arith.constant 1 : i32
    %310 = arith.index_cast %c1_i32_196 : i32 to index
    %c0_197 = arith.constant 0 : index
    %c0_198 = arith.constant 0 : index
    %311 = vector.load %arg11[%310, %c0_197, %c0_198] : memref<8x2x128xf32, #tpu.memory_space<vmem>>, vector<1x2x128xf32>
    %312 = vector.shape_cast %311 : vector<1x2x128xf32> to vector<2x128xf32>
    %c0_199 = arith.constant 0 : index
    %c0_200 = arith.constant 0 : index
    %313 = vector.load %arg13[%c0_199, %c0_200] : memref<2x32xf32, #tpu.memory_space<vmem>>, vector<2x32xf32>
    %c0_201 = arith.constant 0 : index
    %c0_202 = arith.constant 0 : index
    %314 = vector.load %arg6[%c0_201, %c0_202] : memref<32x128xf32, #tpu.memory_space<vmem>>, vector<32x128xf32>
    %cst_203 = arith.constant dense<0.000000e+00> : vector<2x128xf32>
    %315 = tpu.matmul %313, %314, %cst_203 {dimension_numbers = #tpu.dot_dimension_numbers<[1], [0], [0], [1], [0, 0, 1, 1], [], []>} : vector<2x32xf32>, vector<32x128xf32>, vector<2x128xf32> -> vector<2x128xf32>
    %316 = arith.addf %312, %315 : vector<2x128xf32>
    %317 = vector.extract_strided_slice %316 {offsets = [0, 0], sizes = [2, 96], strides = [1, 1]} : vector<2x128xf32> to vector<2x96xf32>
    %318 = arith.negf %317 : vector<2x96xf32>
    %319 = math.exp %318 : vector<2x96xf32>
    %cst_204 = arith.constant 1.000000e+00 : f32
    %320 = vector.broadcast %cst_204 : f32 to vector<2x96xf32>
    %321 = arith.addf %320, %319 : vector<2x96xf32>
    %322 = arith.divf %320, %321 : vector<2x96xf32>
    %323 = vector.extract_strided_slice %316 {offsets = [0, 96], sizes = [2, 32], strides = [1, 1]} : vector<2x128xf32> to vector<2x32xf32>
    %324 = math.tanh %323 : vector<2x32xf32>
    %325 = vector.extract_strided_slice %322 {offsets = [0, 0], sizes = [2, 32], strides = [1, 1]} : vector<2x96xf32> to vector<2x32xf32>
    %326 = vector.extract_strided_slice %322 {offsets = [0, 32], sizes = [2, 32], strides = [1, 1]} : vector<2x96xf32> to vector<2x32xf32>
    %327 = vector.extract_strided_slice %322 {offsets = [0, 64], sizes = [2, 32], strides = [1, 1]} : vector<2x96xf32> to vector<2x32xf32>
    %c0_205 = arith.constant 0 : index
    %c0_206 = arith.constant 0 : index
    %328 = vector.load %arg14[%c0_205, %c0_206] : memref<2x32xf32, #tpu.memory_space<vmem>>, vector<2x32xf32>
    %329 = arith.mulf %326, %328 : vector<2x32xf32>
    %330 = arith.mulf %325, %324 : vector<2x32xf32>
    %331 = arith.addf %329, %330 : vector<2x32xf32>
    %332 = math.tanh %331 : vector<2x32xf32>
    %333 = arith.mulf %327, %332 : vector<2x32xf32>
    %c0_207 = arith.constant 0 : index
    %c0_208 = arith.constant 0 : index
    %334 = vector.load %arg14[%c0_207, %c0_208] : memref<2x32xf32, #tpu.memory_space<vmem>>, vector<2x32xf32>
    tpu.vector_store %arg14[%c0_207, %c0_208], %331 {strides = array<i32>} : memref<2x32xf32, #tpu.memory_space<vmem>>, vector<2x32xf32>,
    %c0_209 = arith.constant 0 : index
    %c0_210 = arith.constant 0 : index
    %335 = vector.load %arg13[%c0_209, %c0_210] : memref<2x32xf32, #tpu.memory_space<vmem>>, vector<2x32xf32>
    tpu.vector_store %arg13[%c0_209, %c0_210], %333 {strides = array<i32>} : memref<2x32xf32, #tpu.memory_space<vmem>>, vector<2x32xf32>,
    %c2_i32_211 = arith.constant 2 : i32
    %336 = arith.index_cast %c2_i32_211 : i32 to index
    %c0_212 = arith.constant 0 : index
    %c0_213 = arith.constant 0 : index
    %337 = vector.load %arg11[%336, %c0_212, %c0_213] : memref<8x2x128xf32, #tpu.memory_space<vmem>>, vector<1x2x128xf32>
    %338 = vector.shape_cast %337 : vector<1x2x128xf32> to vector<2x128xf32>
    %c0_214 = arith.constant 0 : index
    %c0_215 = arith.constant 0 : index
    %339 = vector.load %arg13[%c0_214, %c0_215] : memref<2x32xf32, #tpu.memory_space<vmem>>, vector<2x32xf32>
    %c0_216 = arith.constant 0 : index
    %c0_217 = arith.constant 0 : index
    %340 = vector.load %arg6[%c0_216, %c0_217] : memref<32x128xf32, #tpu.memory_space<vmem>>, vector<32x128xf32>
    %cst_218 = arith.constant dense<0.000000e+00> : vector<2x128xf32>
    %341 = tpu.matmul %339, %340, %cst_218 {dimension_numbers = #tpu.dot_dimension_numbers<[1], [0], [0], [1], [0, 0, 1, 1], [], []>} : vector<2x32xf32>, vector<32x128xf32>, vector<2x128xf32> -> vector<2x128xf32>
    %342 = arith.addf %338, %341 : vector<2x128xf32>
    %343 = vector.extract_strided_slice %342 {offsets = [0, 0], sizes = [2, 96], strides = [1, 1]} : vector<2x128xf32> to vector<2x96xf32>
    %344 = arith.negf %343 : vector<2x96xf32>
    %345 = math.exp %344 : vector<2x96xf32>
    %cst_219 = arith.constant 1.000000e+00 : f32
    %346 = vector.broadcast %cst_219 : f32 to vector<2x96xf32>
    %347 = arith.addf %346, %345 : vector<2x96xf32>
    %348 = arith.divf %346, %347 : vector<2x96xf32>
    %349 = vector.extract_strided_slice %342 {offsets = [0, 96], sizes = [2, 32], strides = [1, 1]} : vector<2x128xf32> to vector<2x32xf32>
    %350 = math.tanh %349 : vector<2x32xf32>
    %351 = vector.extract_strided_slice %348 {offsets = [0, 0], sizes = [2, 32], strides = [1, 1]} : vector<2x96xf32> to vector<2x32xf32>
    %352 = vector.extract_strided_slice %348 {offsets = [0, 32], sizes = [2, 32], strides = [1, 1]} : vector<2x96xf32> to vector<2x32xf32>
    %353 = vector.extract_strided_slice %348 {offsets = [0, 64], sizes = [2, 32], strides = [1, 1]} : vector<2x96xf32> to vector<2x32xf32>
    %c0_220 = arith.constant 0 : index
    %c0_221 = arith.constant 0 : index
    %354 = vector.load %arg14[%c0_220, %c0_221] : memref<2x32xf32, #tpu.memory_space<vmem>>, vector<2x32xf32>
    %355 = arith.mulf %352, %354 : vector<2x32xf32>
    %356 = arith.mulf %351, %350 : vector<2x32xf32>
    %357 = arith.addf %355, %356 : vector<2x32xf32>
    %358 = math.tanh %357 : vector<2x32xf32>
    %359 = arith.mulf %353, %358 : vector<2x32xf32>
    %c0_222 = arith.constant 0 : index
    %c0_223 = arith.constant 0 : index
    %360 = vector.load %arg14[%c0_222, %c0_223] : memref<2x32xf32, #tpu.memory_space<vmem>>, vector<2x32xf32>
    tpu.vector_store %arg14[%c0_222, %c0_223], %357 {strides = array<i32>} : memref<2x32xf32, #tpu.memory_space<vmem>>, vector<2x32xf32>,
    %c0_224 = arith.constant 0 : index
    %c0_225 = arith.constant 0 : index
    %361 = vector.load %arg13[%c0_224, %c0_225] : memref<2x32xf32, #tpu.memory_space<vmem>>, vector<2x32xf32>
    tpu.vector_store %arg13[%c0_224, %c0_225], %359 {strides = array<i32>} : memref<2x32xf32, #tpu.memory_space<vmem>>, vector<2x32xf32>,
    %c3_i32_226 = arith.constant 3 : i32
    %362 = arith.index_cast %c3_i32_226 : i32 to index
    %c0_227 = arith.constant 0 : index
    %c0_228 = arith.constant 0 : index
    %363 = vector.load %arg11[%362, %c0_227, %c0_228] : memref<8x2x128xf32, #tpu.memory_space<vmem>>, vector<1x2x128xf32>
    %364 = vector.shape_cast %363 : vector<1x2x128xf32> to vector<2x128xf32>
    %c0_229 = arith.constant 0 : index
    %c0_230 = arith.constant 0 : index
    %365 = vector.load %arg13[%c0_229, %c0_230] : memref<2x32xf32, #tpu.memory_space<vmem>>, vector<2x32xf32>
    %c0_231 = arith.constant 0 : index
    %c0_232 = arith.constant 0 : index
    %366 = vector.load %arg6[%c0_231, %c0_232] : memref<32x128xf32, #tpu.memory_space<vmem>>, vector<32x128xf32>
    %cst_233 = arith.constant dense<0.000000e+00> : vector<2x128xf32>
    %367 = tpu.matmul %365, %366, %cst_233 {dimension_numbers = #tpu.dot_dimension_numbers<[1], [0], [0], [1], [0, 0, 1, 1], [], []>} : vector<2x32xf32>, vector<32x128xf32>, vector<2x128xf32> -> vector<2x128xf32>
    %368 = arith.addf %364, %367 : vector<2x128xf32>
    %369 = vector.extract_strided_slice %368 {offsets = [0, 0], sizes = [2, 96], strides = [1, 1]} : vector<2x128xf32> to vector<2x96xf32>
    %370 = arith.negf %369 : vector<2x96xf32>
    %371 = math.exp %370 : vector<2x96xf32>
    %cst_234 = arith.constant 1.000000e+00 : f32
    %372 = vector.broadcast %cst_234 : f32 to vector<2x96xf32>
    %373 = arith.addf %372, %371 : vector<2x96xf32>
    %374 = arith.divf %372, %373 : vector<2x96xf32>
    %375 = vector.extract_strided_slice %368 {offsets = [0, 96], sizes = [2, 32], strides = [1, 1]} : vector<2x128xf32> to vector<2x32xf32>
    %376 = math.tanh %375 : vector<2x32xf32>
    %377 = vector.extract_strided_slice %374 {offsets = [0, 0], sizes = [2, 32], strides = [1, 1]} : vector<2x96xf32> to vector<2x32xf32>
    %378 = vector.extract_strided_slice %374 {offsets = [0, 32], sizes = [2, 32], strides = [1, 1]} : vector<2x96xf32> to vector<2x32xf32>
    %379 = vector.extract_strided_slice %374 {offsets = [0, 64], sizes = [2, 32], strides = [1, 1]} : vector<2x96xf32> to vector<2x32xf32>
    %c0_235 = arith.constant 0 : index
    %c0_236 = arith.constant 0 : index
    %380 = vector.load %arg14[%c0_235, %c0_236] : memref<2x32xf32, #tpu.memory_space<vmem>>, vector<2x32xf32>
    %381 = arith.mulf %378, %380 : vector<2x32xf32>
    %382 = arith.mulf %377, %376 : vector<2x32xf32>
    %383 = arith.addf %381, %382 : vector<2x32xf32>
    %384 = math.tanh %383 : vector<2x32xf32>
    %385 = arith.mulf %379, %384 : vector<2x32xf32>
    %c0_237 = arith.constant 0 : index
    %c0_238 = arith.constant 0 : index
    %386 = vector.load %arg14[%c0_237, %c0_238] : memref<2x32xf32, #tpu.memory_space<vmem>>, vector<2x32xf32>
    tpu.vector_store %arg14[%c0_237, %c0_238], %383 {strides = array<i32>} : memref<2x32xf32, #tpu.memory_space<vmem>>, vector<2x32xf32>,
    %c0_239 = arith.constant 0 : index
    %c0_240 = arith.constant 0 : index
    %387 = vector.load %arg13[%c0_239, %c0_240] : memref<2x32xf32, #tpu.memory_space<vmem>>, vector<2x32xf32>
    tpu.vector_store %arg13[%c0_239, %c0_240], %385 {strides = array<i32>} : memref<2x32xf32, #tpu.memory_space<vmem>>, vector<2x32xf32>,
    %c4_i32_241 = arith.constant 4 : i32
    %388 = arith.index_cast %c4_i32_241 : i32 to index
    %c0_242 = arith.constant 0 : index
    %c0_243 = arith.constant 0 : index
    %389 = vector.load %arg11[%388, %c0_242, %c0_243] : memref<8x2x128xf32, #tpu.memory_space<vmem>>, vector<1x2x128xf32>
    %390 = vector.shape_cast %389 : vector<1x2x128xf32> to vector<2x128xf32>
    %c0_244 = arith.constant 0 : index
    %c0_245 = arith.constant 0 : index
    %391 = vector.load %arg13[%c0_244, %c0_245] : memref<2x32xf32, #tpu.memory_space<vmem>>, vector<2x32xf32>
    %c0_246 = arith.constant 0 : index
    %c0_247 = arith.constant 0 : index
    %392 = vector.load %arg6[%c0_246, %c0_247] : memref<32x128xf32, #tpu.memory_space<vmem>>, vector<32x128xf32>
    %cst_248 = arith.constant dense<0.000000e+00> : vector<2x128xf32>
    %393 = tpu.matmul %391, %392, %cst_248 {dimension_numbers = #tpu.dot_dimension_numbers<[1], [0], [0], [1], [0, 0, 1, 1], [], []>} : vector<2x32xf32>, vector<32x128xf32>, vector<2x128xf32> -> vector<2x128xf32>
    %394 = arith.addf %390, %393 : vector<2x128xf32>
    %395 = vector.extract_strided_slice %394 {offsets = [0, 0], sizes = [2, 96], strides = [1, 1]} : vector<2x128xf32> to vector<2x96xf32>
    %396 = arith.negf %395 : vector<2x96xf32>
    %397 = math.exp %396 : vector<2x96xf32>
    %cst_249 = arith.constant 1.000000e+00 : f32
    %398 = vector.broadcast %cst_249 : f32 to vector<2x96xf32>
    %399 = arith.addf %398, %397 : vector<2x96xf32>
    %400 = arith.divf %398, %399 : vector<2x96xf32>
    %401 = vector.extract_strided_slice %394 {offsets = [0, 96], sizes = [2, 32], strides = [1, 1]} : vector<2x128xf32> to vector<2x32xf32>
    %402 = math.tanh %401 : vector<2x32xf32>
    %403 = vector.extract_strided_slice %400 {offsets = [0, 0], sizes = [2, 32], strides = [1, 1]} : vector<2x96xf32> to vector<2x32xf32>
    %404 = vector.extract_strided_slice %400 {offsets = [0, 32], sizes = [2, 32], strides = [1, 1]} : vector<2x96xf32> to vector<2x32xf32>
    %405 = vector.extract_strided_slice %400 {offsets = [0, 64], sizes = [2, 32], strides = [1, 1]} : vector<2x96xf32> to vector<2x32xf32>
    %c0_250 = arith.constant 0 : index
    %c0_251 = arith.constant 0 : index
    %406 = vector.load %arg14[%c0_250, %c0_251] : memref<2x32xf32, #tpu.memory_space<vmem>>, vector<2x32xf32>
    %407 = arith.mulf %404, %406 : vector<2x32xf32>
    %408 = arith.mulf %403, %402 : vector<2x32xf32>
    %409 = arith.addf %407, %408 : vector<2x32xf32>
    %410 = math.tanh %409 : vector<2x32xf32>
    %411 = arith.mulf %405, %410 : vector<2x32xf32>
    %c0_252 = arith.constant 0 : index
    %c0_253 = arith.constant 0 : index
    %412 = vector.load %arg14[%c0_252, %c0_253] : memref<2x32xf32, #tpu.memory_space<vmem>>, vector<2x32xf32>
    tpu.vector_store %arg14[%c0_252, %c0_253], %409 {strides = array<i32>} : memref<2x32xf32, #tpu.memory_space<vmem>>, vector<2x32xf32>,
    %c0_254 = arith.constant 0 : index
    %c0_255 = arith.constant 0 : index
    %413 = vector.load %arg13[%c0_254, %c0_255] : memref<2x32xf32, #tpu.memory_space<vmem>>, vector<2x32xf32>
    tpu.vector_store %arg13[%c0_254, %c0_255], %411 {strides = array<i32>} : memref<2x32xf32, #tpu.memory_space<vmem>>, vector<2x32xf32>,
    %c5_i32_256 = arith.constant 5 : i32
    %414 = arith.index_cast %c5_i32_256 : i32 to index
    %c0_257 = arith.constant 0 : index
    %c0_258 = arith.constant 0 : index
    %415 = vector.load %arg11[%414, %c0_257, %c0_258] : memref<8x2x128xf32, #tpu.memory_space<vmem>>, vector<1x2x128xf32>
    %416 = vector.shape_cast %415 : vector<1x2x128xf32> to vector<2x128xf32>
    %c0_259 = arith.constant 0 : index
    %c0_260 = arith.constant 0 : index
    %417 = vector.load %arg13[%c0_259, %c0_260] : memref<2x32xf32, #tpu.memory_space<vmem>>, vector<2x32xf32>
    %c0_261 = arith.constant 0 : index
    %c0_262 = arith.constant 0 : index
    %418 = vector.load %arg6[%c0_261, %c0_262] : memref<32x128xf32, #tpu.memory_space<vmem>>, vector<32x128xf32>
    %cst_263 = arith.constant dense<0.000000e+00> : vector<2x128xf32>
    %419 = tpu.matmul %417, %418, %cst_263 {dimension_numbers = #tpu.dot_dimension_numbers<[1], [0], [0], [1], [0, 0, 1, 1], [], []>} : vector<2x32xf32>, vector<32x128xf32>, vector<2x128xf32> -> vector<2x128xf32>
    %420 = arith.addf %416, %419 : vector<2x128xf32>
    %421 = vector.extract_strided_slice %420 {offsets = [0, 0], sizes = [2, 96], strides = [1, 1]} : vector<2x128xf32> to vector<2x96xf32>
    %422 = arith.negf %421 : vector<2x96xf32>
    %423 = math.exp %422 : vector<2x96xf32>
    %cst_264 = arith.constant 1.000000e+00 : f32
    %424 = vector.broadcast %cst_264 : f32 to vector<2x96xf32>
    %425 = arith.addf %424, %423 : vector<2x96xf32>
    %426 = arith.divf %424, %425 : vector<2x96xf32>
    %427 = vector.extract_strided_slice %420 {offsets = [0, 96], sizes = [2, 32], strides = [1, 1]} : vector<2x128xf32> to vector<2x32xf32>
    %428 = math.tanh %427 : vector<2x32xf32>
    %429 = vector.extract_strided_slice %426 {offsets = [0, 0], sizes = [2, 32], strides = [1, 1]} : vector<2x96xf32> to vector<2x32xf32>
    %430 = vector.extract_strided_slice %426 {offsets = [0, 32], sizes = [2, 32], strides = [1, 1]} : vector<2x96xf32> to vector<2x32xf32>
    %431 = vector.extract_strided_slice %426 {offsets = [0, 64], sizes = [2, 32], strides = [1, 1]} : vector<2x96xf32> to vector<2x32xf32>
    %c0_265 = arith.constant 0 : index
    %c0_266 = arith.constant 0 : index
    %432 = vector.load %arg14[%c0_265, %c0_266] : memref<2x32xf32, #tpu.memory_space<vmem>>, vector<2x32xf32>
    %433 = arith.mulf %430, %432 : vector<2x32xf32>
    %434 = arith.mulf %429, %428 : vector<2x32xf32>
    %435 = arith.addf %433, %434 : vector<2x32xf32>
    %436 = math.tanh %435 : vector<2x32xf32>
    %437 = arith.mulf %431, %436 : vector<2x32xf32>
    %c0_267 = arith.constant 0 : index
    %c0_268 = arith.constant 0 : index
    %438 = vector.load %arg14[%c0_267, %c0_268] : memref<2x32xf32, #tpu.memory_space<vmem>>, vector<2x32xf32>
    tpu.vector_store %arg14[%c0_267, %c0_268], %435 {strides = array<i32>} : memref<2x32xf32, #tpu.memory_space<vmem>>, vector<2x32xf32>,
    %c0_269 = arith.constant 0 : index
    %c0_270 = arith.constant 0 : index
    %439 = vector.load %arg13[%c0_269, %c0_270] : memref<2x32xf32, #tpu.memory_space<vmem>>, vector<2x32xf32>
    tpu.vector_store %arg13[%c0_269, %c0_270], %437 {strides = array<i32>} : memref<2x32xf32, #tpu.memory_space<vmem>>, vector<2x32xf32>,
    %c6_i32_271 = arith.constant 6 : i32
    %440 = arith.index_cast %c6_i32_271 : i32 to index
    %c0_272 = arith.constant 0 : index
    %c0_273 = arith.constant 0 : index
    %441 = vector.load %arg11[%440, %c0_272, %c0_273] : memref<8x2x128xf32, #tpu.memory_space<vmem>>, vector<1x2x128xf32>
    %442 = vector.shape_cast %441 : vector<1x2x128xf32> to vector<2x128xf32>
    %c0_274 = arith.constant 0 : index
    %c0_275 = arith.constant 0 : index
    %443 = vector.load %arg13[%c0_274, %c0_275] : memref<2x32xf32, #tpu.memory_space<vmem>>, vector<2x32xf32>
    %c0_276 = arith.constant 0 : index
    %c0_277 = arith.constant 0 : index
    %444 = vector.load %arg6[%c0_276, %c0_277] : memref<32x128xf32, #tpu.memory_space<vmem>>, vector<32x128xf32>
    %cst_278 = arith.constant dense<0.000000e+00> : vector<2x128xf32>
    %445 = tpu.matmul %443, %444, %cst_278 {dimension_numbers = #tpu.dot_dimension_numbers<[1], [0], [0], [1], [0, 0, 1, 1], [], []>} : vector<2x32xf32>, vector<32x128xf32>, vector<2x128xf32> -> vector<2x128xf32>
    %446 = arith.addf %442, %445 : vector<2x128xf32>
    %447 = vector.extract_strided_slice %446 {offsets = [0, 0], sizes = [2, 96], strides = [1, 1]} : vector<2x128xf32> to vector<2x96xf32>
    %448 = arith.negf %447 : vector<2x96xf32>
    %449 = math.exp %448 : vector<2x96xf32>
    %cst_279 = arith.constant 1.000000e+00 : f32
    %450 = vector.broadcast %cst_279 : f32 to vector<2x96xf32>
    %451 = arith.addf %450, %449 : vector<2x96xf32>
    %452 = arith.divf %450, %451 : vector<2x96xf32>
    %453 = vector.extract_strided_slice %446 {offsets = [0, 96], sizes = [2, 32], strides = [1, 1]} : vector<2x128xf32> to vector<2x32xf32>
    %454 = math.tanh %453 : vector<2x32xf32>
    %455 = vector.extract_strided_slice %452 {offsets = [0, 0], sizes = [2, 32], strides = [1, 1]} : vector<2x96xf32> to vector<2x32xf32>
    %456 = vector.extract_strided_slice %452 {offsets = [0, 32], sizes = [2, 32], strides = [1, 1]} : vector<2x96xf32> to vector<2x32xf32>
    %457 = vector.extract_strided_slice %452 {offsets = [0, 64], sizes = [2, 32], strides = [1, 1]} : vector<2x96xf32> to vector<2x32xf32>
    %c0_280 = arith.constant 0 : index
    %c0_281 = arith.constant 0 : index
    %458 = vector.load %arg14[%c0_280, %c0_281] : memref<2x32xf32, #tpu.memory_space<vmem>>, vector<2x32xf32>
    %459 = arith.mulf %456, %458 : vector<2x32xf32>
    %460 = arith.mulf %455, %454 : vector<2x32xf32>
    %461 = arith.addf %459, %460 : vector<2x32xf32>
    %462 = math.tanh %461 : vector<2x32xf32>
    %463 = arith.mulf %457, %462 : vector<2x32xf32>
    %c0_282 = arith.constant 0 : index
    %c0_283 = arith.constant 0 : index
    %464 = vector.load %arg14[%c0_282, %c0_283] : memref<2x32xf32, #tpu.memory_space<vmem>>, vector<2x32xf32>
    tpu.vector_store %arg14[%c0_282, %c0_283], %461 {strides = array<i32>} : memref<2x32xf32, #tpu.memory_space<vmem>>, vector<2x32xf32>,
    %c0_284 = arith.constant 0 : index
    %c0_285 = arith.constant 0 : index
    %465 = vector.load %arg13[%c0_284, %c0_285] : memref<2x32xf32, #tpu.memory_space<vmem>>, vector<2x32xf32>
    tpu.vector_store %arg13[%c0_284, %c0_285], %463 {strides = array<i32>} : memref<2x32xf32, #tpu.memory_space<vmem>>, vector<2x32xf32>,
    %c7_i32_286 = arith.constant 7 : i32
    %466 = arith.index_cast %c7_i32_286 : i32 to index
    %c0_287 = arith.constant 0 : index
    %c0_288 = arith.constant 0 : index
    %467 = vector.load %arg11[%466, %c0_287, %c0_288] : memref<8x2x128xf32, #tpu.memory_space<vmem>>, vector<1x2x128xf32>
    %468 = vector.shape_cast %467 : vector<1x2x128xf32> to vector<2x128xf32>
    %c0_289 = arith.constant 0 : index
    %c0_290 = arith.constant 0 : index
    %469 = vector.load %arg13[%c0_289, %c0_290] : memref<2x32xf32, #tpu.memory_space<vmem>>, vector<2x32xf32>
    %c0_291 = arith.constant 0 : index
    %c0_292 = arith.constant 0 : index
    %470 = vector.load %arg6[%c0_291, %c0_292] : memref<32x128xf32, #tpu.memory_space<vmem>>, vector<32x128xf32>
    %cst_293 = arith.constant dense<0.000000e+00> : vector<2x128xf32>
    %471 = tpu.matmul %469, %470, %cst_293 {dimension_numbers = #tpu.dot_dimension_numbers<[1], [0], [0], [1], [0, 0, 1, 1], [], []>} : vector<2x32xf32>, vector<32x128xf32>, vector<2x128xf32> -> vector<2x128xf32>
    %472 = arith.addf %468, %471 : vector<2x128xf32>
    %473 = vector.extract_strided_slice %472 {offsets = [0, 0], sizes = [2, 96], strides = [1, 1]} : vector<2x128xf32> to vector<2x96xf32>
    %474 = arith.negf %473 : vector<2x96xf32>
    %475 = math.exp %474 : vector<2x96xf32>
    %cst_294 = arith.constant 1.000000e+00 : f32
    %476 = vector.broadcast %cst_294 : f32 to vector<2x96xf32>
    %477 = arith.addf %476, %475 : vector<2x96xf32>
    %478 = arith.divf %476, %477 : vector<2x96xf32>
    %479 = vector.extract_strided_slice %472 {offsets = [0, 96], sizes = [2, 32], strides = [1, 1]} : vector<2x128xf32> to vector<2x32xf32>
    %480 = math.tanh %479 : vector<2x32xf32>
    %481 = vector.extract_strided_slice %478 {offsets = [0, 0], sizes = [2, 32], strides = [1, 1]} : vector<2x96xf32> to vector<2x32xf32>
    %482 = vector.extract_strided_slice %478 {offsets = [0, 32], sizes = [2, 32], strides = [1, 1]} : vector<2x96xf32> to vector<2x32xf32>
    %483 = vector.extract_strided_slice %478 {offsets = [0, 64], sizes = [2, 32], strides = [1, 1]} : vector<2x96xf32> to vector<2x32xf32>
    %c0_295 = arith.constant 0 : index
    %c0_296 = arith.constant 0 : index
    %484 = vector.load %arg14[%c0_295, %c0_296] : memref<2x32xf32, #tpu.memory_space<vmem>>, vector<2x32xf32>
    %485 = arith.mulf %482, %484 : vector<2x32xf32>
    %486 = arith.mulf %481, %480 : vector<2x32xf32>
    %487 = arith.addf %485, %486 : vector<2x32xf32>
    %488 = math.tanh %487 : vector<2x32xf32>
    %489 = arith.mulf %483, %488 : vector<2x32xf32>
    %c0_297 = arith.constant 0 : index
    %c0_298 = arith.constant 0 : index
    %490 = vector.load %arg14[%c0_297, %c0_298] : memref<2x32xf32, #tpu.memory_space<vmem>>, vector<2x32xf32>
    tpu.vector_store %arg14[%c0_297, %c0_298], %487 {strides = array<i32>} : memref<2x32xf32, #tpu.memory_space<vmem>>, vector<2x32xf32>,
    %c0_299 = arith.constant 0 : index
    %c0_300 = arith.constant 0 : index
    %491 = vector.load %arg13[%c0_299, %c0_300] : memref<2x32xf32, #tpu.memory_space<vmem>>, vector<2x32xf32>
    tpu.vector_store %arg13[%c0_299, %c0_300], %489 {strides = array<i32>} : memref<2x32xf32, #tpu.memory_space<vmem>>, vector<2x32xf32>,
    %c8_i32_301 = arith.constant 8 : i32
    %c0_302 = arith.constant 0 : index
    %c0_303 = arith.constant 0 : index
    %492 = vector.load %arg13[%c0_302, %c0_303] : memref<2x32xf32, #tpu.memory_space<vmem>>, vector<2x32xf32>
    %c0_304 = arith.constant 0 : index
    %c0_305 = arith.constant 0 : index
    %493 = vector.load %arg8[%c0_304, %c0_305] : memref<32x4xf32, #tpu.memory_space<vmem>>, vector<32x4xf32>
    %cst_306 = arith.constant dense<0.000000e+00> : vector<2x4xf32>
    %494 = tpu.matmul %492, %493, %cst_306 {dimension_numbers = #tpu.dot_dimension_numbers<[1], [0], [0], [1], [0, 0, 1, 1], [], []>} : vector<2x32xf32>, vector<32x4xf32>, vector<2x4xf32> -> vector<2x4xf32>
    %c0_307 = arith.constant 0 : index
    %c0_308 = arith.constant 0 : index
    %495 = vector.load %arg9[%c0_307, %c0_308] : memref<1x4xf32, #tpu.memory_space<vmem>>, vector<1x4xf32>
    %496 = vector.broadcast %495 : vector<1x4xf32> to vector<2x4xf32>
    %497 = arith.addf %494, %496 : vector<2x4xf32>
    %c0_309 = arith.constant 0 : index
    %c0_310 = arith.constant 0 : index
    %498 = vector.load %arg10[%c0_309, %c0_310] : memref<2x4xf32, #tpu.memory_space<vmem>>, vector<2x4xf32>
    tpu.vector_store %arg10[%c0_309, %c0_310], %497 {strides = array<i32>} : memref<2x4xf32, #tpu.memory_space<vmem>>, vector<2x4xf32>,
    return
  }
  func.func @transform_0(%arg0: i32) -> (i32, i32, i32) {
    %c0_i32 = arith.constant 0 : i32
    %c0_i32_0 = arith.constant 0 : i32
    %c0_i32_1 = arith.constant 0 : i32
    return %arg0, %c0_i32, %c0_i32_0 : i32, i32, i32
  }
  func.func @transform_1(%arg0: i32) -> (i32, i32) {
    %c0_i32 = arith.constant 0 : i32
    %c0_i32_0 = arith.constant 0 : i32
    %c0_i32_1 = arith.constant 0 : i32
    return %c0_i32, %c0_i32_0 : i32, i32
  }
  func.func @transform_2(%arg0: i32) -> (i32, i32) {
    %c0_i32 = arith.constant 0 : i32
    %c0_i32_0 = arith.constant 0 : i32
    %c0_i32_1 = arith.constant 0 : i32
    return %c0_i32, %c0_i32_0 : i32, i32
  }
  func.func @transform_3(%arg0: i32) -> (i32, i32) {
    %c0_i32 = arith.constant 0 : i32
    %c0_i32_0 = arith.constant 0 : i32
    %c0_i32_1 = arith.constant 0 : i32
    return %c0_i32, %c0_i32_0 : i32, i32
  }
  func.func @transform_4(%arg0: i32) -> (i32, i32) {
    %c0_i32 = arith.constant 0 : i32
    %c0_i32_0 = arith.constant 0 : i32
    %c0_i32_1 = arith.constant 0 : i32
    return %c0_i32, %c0_i32_0 : i32, i32
  }
  func.func @transform_5(%arg0: i32) -> (i32, i32) {
    %c0_i32 = arith.constant 0 : i32
    %c0_i32_0 = arith.constant 0 : i32
    %c0_i32_1 = arith.constant 0 : i32
    return %c0_i32, %c0_i32_0 : i32, i32
  }
  func.func @transform_6(%arg0: i32) -> (i32, i32) {
    %c0_i32 = arith.constant 0 : i32
    %c0_i32_0 = arith.constant 0 : i32
    %c0_i32_1 = arith.constant 0 : i32
    return %c0_i32, %c0_i32_0 : i32, i32
  }
  func.func @transform_7(%arg0: i32) -> (i32, i32) {
    %c0_i32 = arith.constant 0 : i32
    %c0_i32_0 = arith.constant 0 : i32
    %c0_i32_1 = arith.constant 0 : i32
    return %c0_i32, %c0_i32_0 : i32, i32
  }
  func.func @transform_8(%arg0: i32) -> (i32, i32) {
    %c0_i32 = arith.constant 0 : i32
    %c0_i32_0 = arith.constant 0 : i32
    %c0_i32_1 = arith.constant 0 : i32
    return %c0_i32, %c0_i32_0 : i32, i32
  }
  func.func @transform_9(%arg0: i32) -> (i32, i32) {
    %c0_i32 = arith.constant 0 : i32
    %c0_i32_0 = arith.constant 0 : i32
    return %arg0, %c0_i32 : i32, i32
  }
}

</mosaic_0001>

<bundles_post_ra>
// kernel: tpu_custom_call.1
= control target key start
LH: loop header
LB: loop body
LE: loop exit
PB: predicated region body
PF: predicated region fallthrough
CT: control target
= control target key end

     0   :  { %14 = vsyncpa [#allocation7], 0  ;;  %s2329_s0 = inlined_call_operand.vmem [shape: f32[2,8,4], index: 0, kind: input, shape index: {}]   ;;  %s2330_s1 = inlined_call_operand.vmem [shape: f32[4,128], index: 1, kind: input, shape index: {}]   ;;  %s2331_s2 = inlined_call_operand.vmem [shape: f32[32,128], index: 2, kind: input, shape index: {}]   ;;  %s2332_s3 = inlined_call_operand.vmem [shape: f32[1,128], index: 3, kind: input, shape index: {}]   ;;  %s2333_s4 = inlined_call_operand.hbm [shape: f32[32,128], index: 4, kind: input, shape index: {}]   ;;  %s2334_s5 = inlined_call_operand.hbm [shape: f32[32,128], index: 5, kind: input, shape index: {}]   ;;  %s2335_s6 = inlined_call_operand.vmem [shape: f32[1,128], index: 6, kind: input, shape index: {}]   ;;  %s2336_s7 = inlined_call_operand.vmem [shape: f32[32,4], index: 7, kind: input, shape index: {}]   ;;  %s2337_s8 = inlined_call_operand.vmem [shape: f32[1,4], index: 8, kind: input, shape index: {}]   ;;  %s2338_s9 = inlined_call_operand.hbm [shape: f32[2,4], index: 9, kind: output, shape index: {}]  }
   0x1   :  { %15 = vsyncpa [#allocation10], 0 }
   0x2   :  { %16 = vsyncpa [#allocation8], 0  ;;  %s29_s11 = sshll.u32 %s2333_s4, 4  ;;  %s2003_s12 = smov [#allocation6]   ;;  %s30_s11 = int_to_ptr.hbm [resolvable:$true] %s29_s11 }
   0x3   :  { %s31_s13 = sshll.u32 %s2003_s12, 4  ;;  %s42_s16 = sshll.u32 %s2334_s5, 4  ;;  %s32_s13 = int_to_ptr.vmem [resolvable:$true] %s31_s13  ;;  %s43_s16 = int_to_ptr.hbm [resolvable:$true] %s42_s16 }
   0x4   :  { %s2004_s17 = smov 128   ;;  %s2005_s18 = smov 8  }
   0x5   :  { %37 = dma.hbm_to_vmem [thread:$0]  %s30_s11, 512, %s32_s13, [#allocation7], %s2004_s17, %s2004_s17, %s2005_s18  }
   0x6   :  { %s2006_s19 = smov [#allocation9]  }
   0x7   :  { %s44_s20 = sshll.u32 %s2006_s19, 4  ;;  %s45_s20 = int_to_ptr.vmem [resolvable:$true] %s44_s20 }
   0x8   :  { %50 = dma.hbm_to_vmem [thread:$0]  %s43_s16, 512, %s45_s20, [#allocation10], %s2004_s17, %s2004_s17, %s2005_s18  }
   0x9   :  { %1997 = dma.done.wait [#allocation7], 512  }
   0xa   :  { %1998 = vsyncadd [#allocation7], 4294966784 }
   0xb   :  { %1999 = dma.done.wait [#allocation10], 512  }
   0xc   :  { %2000 = vsyncadd [#allocation10], 4294966784  ;;  %vm178_vm0 = vcmask 254976   ;;  %v2007_v0 = vmov 0.0   ;;  %vm75_vm1 = vcmask 1043456   ;;  %vm71_vm2 = vcmask 31744  }
   0xd   :  { %179 = vst.msk [vmem:[#allocation4] sm:$0x3] %vm178_vm0, %v2007_v0  ;;  %v186_v1 = vld [vmem:[%s2331_s2 + $0x18] sm:$0xff]  ;;  %v66_v2 = vld [vmem:[%s2330_s1] sm:$0xf]  ;;  %v185_v4 = vld [vmem:[%s2331_s2 + $0x10] sm:$0xff] }
   0xe   :  { %180 = vst.msk [vmem:[#allocation5] sm:$0x3] %vm178_vm0, %v2007_v0  ;;  %v124_v3 = vld [vmem:[%s2330_s1] sm:$0xf]  ;;  %203 = vmatpush.msra.mxu2 %v186_v1  ;;  %1743 = vmatpush.msk.msra.mxu0 %vm75_vm1, %v66_v2  ;;  %v1745_v6 = vld [vmem:[%s2329_s0 + $0x8] sm:$0xff]  ;;  %vm187_vm3 = vcmask 261120  }
   0xf   :  { %v65_v5 = vld [vmem:[%s2329_s0] sm:$0xff]  ;;  %1746 = vmatpush.msk.msra.mxu1 %vm75_vm1, %v124_v3  ;;  %v184_v7 = vld [vmem:[%s2331_s2 + $0x8] sm:$0xff]  ;;  %287 = vmatpush.msra.mxu3 %v186_v1  ;;  %s2009_s15 = smov 64   ;;  %s2010_s16 = smov 96  }
  0x10   :  { %1744 = vmatmul.msk.f32.vlgmr.msra.gmra.mxu0 %vm71_vm2, %v65_v5  ;;  %204 = vmatpush.msra.mxu2 %v185_v4  ;;  %v183_v8 = vld [vmem:[%s2331_s2] sm:$0xff]  ;;  %s2011_s28 = smov [#allocation11]   ;;  %s1732_s11 = sshll.u32 %s2338_s9, 4  ;;  %s1733_s11 = int_to_ptr.hbm [resolvable:$true] %s1732_s11 }
  0x11   :  { %1747 = vmatmul.msk.f32.vlgmr.msra.gmra.mxu1 %vm71_vm2, %v1745_v6  ;;  %372 = vmatpush.msrb.mxu0 %v186_v1  ;;  %v1792_v10 = vld [vmem:[%s2332_s3] ss:$0 sm:$0xff]  ;;  %s1730_s29 = sshll.u32 %s2011_s28, 4  ;;  %s1731_s29 = int_to_ptr.vmem [resolvable:$true] %s1730_s29 }
  0x12   :  { %205 = vmatpush.msra.mxu2 %v184_v7  ;;  %457 = vmatpush.msrb.mxu1 %v186_v1  ;;  %v1793_v11 = vld [vmem:[%s2332_s3] ss:$0 sm:$0xff]  ;;  %s2008_s3 = smov 32  }
  0x13   :  { %288 = vmatpush.msra.mxu3 %v185_v4  ;;  %373 = vmatpush.msrb.mxu0 %v185_v4 }
  0x14   :  { %v182_v9 = vld [vmem:[#allocation4] sm:$0x3]  ;;  %206 = vmatpush.msra.mxu2 %v183_v8  ;;  %458 = vmatpush.msrb.mxu1 %v185_v4 }
  0x15   :  { %1748 = vmatmul.msk.f32.vlgmr.msra.gmra.mxu2 %vm187_vm3, %v182_v9  ;;  %289 = vmatpush.msra.mxu3 %v184_v7  ;;  %v232_v34 = vld [vmem:[#allocation5] sm:$0x3] }
  0x16   :  { %374 = vmatpush.msrb.mxu0 %v184_v7  ;;  %459 = vmatpush.msrb.mxu1 %v184_v7 }
  0x17   :  { %290 = vmatpush.msra.mxu3 %v183_v8  ;;  %542 = vmatpush.msrb.mxu2 %v186_v1 }
  0x18   :  { %375 = vmatpush.msrb.mxu0 %v183_v8  ;;  %460 = vmatpush.msrb.mxu1 %v183_v8 }
  0x19   :  { %543 = vmatpush.msrb.mxu2 %v185_v4  ;;  %627 = vmatpush.msrb.mxu3 %v186_v1 }
  0x1a   :  { %712 = vmatpush.msra.mxu0 %v186_v1  ;;  %797 = vmatpush.msra.mxu1 %v186_v1 }
  0x1b   :  { %544 = vmatpush.msrb.mxu2 %v184_v7  ;;  %628 = vmatpush.msrb.mxu3 %v185_v4 }
  0x1c   :  { %713 = vmatpush.msra.mxu0 %v185_v4  ;;  %798 = vmatpush.msra.mxu1 %v185_v4 }
  0x1d   :  { %545 = vmatpush.msrb.mxu2 %v183_v8  ;;  %629 = vmatpush.msrb.mxu3 %v184_v7 }
  0x1e   :  { %714 = vmatpush.msra.mxu0 %v184_v7  ;;  %799 = vmatpush.msra.mxu1 %v184_v7 }
  0x1f   :  { %630 = vmatpush.msrb.mxu3 %v183_v8 }
  0x20   :  { %715 = vmatpush.msra.mxu0 %v183_v8  ;;  %800 = vmatpush.msra.mxu1 %v183_v8 }
  0x8d   :  { %v96_v12 = vpop.f32.mrf.mxu0 }
  0x8e   :  { %v97_v13 = vadd.f32 %v1792_v10, %v96_v12  ;;  %v152_v14 = vpop.f32.mrf.mxu1 }
  0x8f   :  { %v153_v15 = vadd.f32 %v1793_v11, %v152_v14 }
  0x90   :  { %v100_v16 = vrot.slane %v97_v13, 1  ;;  %v101_v17 = vrot.slane %v97_v13, 2  ;;  %v102_v18 = vrot.slane %v97_v13, 3  ;;  %114 = vst [vmem:[#allocation2] sm:$0x1] %v97_v13  ;;  %v103_v19 = vrot.slane %v97_v13, 4 }
  0x91   :  { %170 = vst [vmem:[#allocation2 + $0x1] sm:$0x1] %v153_v15  ;;  %v104_v20 = vrot.slane %v97_v13, 5  ;;  %v105_v21 = vrot.slane %v97_v13, 6  ;;  %v106_v22 = vrot.slane %v97_v13, 7  ;;  %v156_v23 = vrot.slane %v153_v15, 1 }
  0x92   :  { %115 = vst [vmem:[#allocation2 + $0x2] sm:$0x1] %v100_v16  ;;  %v157_v24 = vrot.slane %v153_v15, 2  ;;  %v158_v25 = vrot.slane %v153_v15, 3  ;;  %v159_v26 = vrot.slane %v153_v15, 4  ;;  %v160_v28 = vrot.slane %v153_v15, 5 }
  0x93   :  { %116 = vst [vmem:[#allocation2 + $0x4] sm:$0x1] %v101_v17  ;;  %v161_v30 = vrot.slane %v153_v15, 6  ;;  %v162_v32 = vrot.slane %v153_v15, 7 }
  0x94   :  { %117 = vst [vmem:[#allocation2 + $0x6] sm:$0x1] %v102_v18 }
  0x95   :  { %118 = vst [vmem:[#allocation2 + $0x8] sm:$0x1] %v103_v19 }
  0x96   :  { %119 = vst [vmem:[#allocation2 + $0xa] sm:$0x1] %v104_v20 }
  0x97   :  { %120 = vst [vmem:[#allocation2 + $0xc] sm:$0x1] %v105_v21 }
  0x98   :  { %121 = vst [vmem:[#allocation2 + $0xe] sm:$0x1] %v106_v22  ;;  %v181_v27 = vld [vmem:[#allocation2] sm:$0x3]  ;;  %v208_v29 = vpop.f32.mrf.mxu2 }
  0x99   :  { %171 = vst [vmem:[#allocation2 + $0x3] sm:$0x1] %v156_v23  ;;  %v211_v31 = vadd.f32 %v208_v29, %v181_v27 }
  0x9a   :  { %172 = vst [vmem:[#allocation2 + $0x5] sm:$0x1] %v157_v24 }
  0x9b   :  { %173 = vst [vmem:[#allocation2 + $0x7] sm:$0x1] %v158_v25  ;;  %1797 = vtanh.f32 %v211_v31  ;;  %v1749_v35 = vmul.f32 -1.442695, %v211_v31 }
  0x9c   :  { %174 = vst [vmem:[#allocation2 + $0x9] sm:$0x1] %v159_v26 }
  0x9d   :  { %175 = vst [vmem:[#allocation2 + $0xb] sm:$0x1] %v160_v28  ;;  %1799 = vpow2.f32 %v1749_v35 }
  0x9e   :  { %176 = vst [vmem:[#allocation2 + $0xd] sm:$0x1] %v161_v30 }
  0x9f   :  { %177 = vst [vmem:[#allocation2 + $0xf] sm:$0x1] %v162_v32 }
  0xa0   :  { %v266_v61 = vld [vmem:[#allocation2 + $0x2] sm:$0x3] }
  0xa1   :  { %v1798_v33 = vpop.eup %1797  ;;  %v351_v28 = vld [vmem:[#allocation2 + $0x4] sm:$0x3] }
  0xa2   :  { %239 = vrot.lane.b32.xlu0 %v1798_v33, %s2008_s3 }
  0xa3   :  { %v1800_v36 = vpop.eup %1799 }
  0xa4   :  { %v215_v37 = vadd.f32 1.0, %v1800_v36 }
  0xa6   :  { %1801 = vrcp.f32 %v215_v37  ;;  %v227_v43 = vand.u32 2147483648, %v215_v37  ;;  %vm221_vm5 = vweird.f32 %v215_v37  ;;  %v225_v44 = vand.u32 2147483647, %v215_v37 }
  0xa8   :  { %v228_v46 = vor.u32 1.1754944e-38, %v227_v43  ;;  %vm226_vm7 = vcmp.eq.f32.partialorder %v225_v44, 8.507059e+37 }
  0xaa   :  { %234 = vrot.lane.b32.xlu0 %v232_v34, %s2008_s3 }
  0xac   :  { %v1802_v38 = vpop.eup %1801 }
  0xad   :  { %v217_v39 = vmul.f32 %v1802_v38, %v215_v37  ;;  %vm222_vm4 = vweird.f32 %v1802_v38 }
  0xae   :  { %vm223_vm6 = vmor %vm221_vm5, %vm222_vm4 }
  0xaf   :  { %v218_v40 = vsub.f32 1.0, %v217_v39 }
  0xb1   :  { %v219_v41 = vmul.f32 %v1802_v38, %v218_v40 }
  0xb3   :  { %v220_v42 = vadd.f32 %v1802_v38, %v219_v41 }
  0xb5   :  { %v224_v45 = vsel %vm223_vm6, %v1802_v38, %v220_v42 }
  0xb6   :  { %v229_v48 = vsel %vm226_vm7, %v228_v46, %v224_v45 }
 0x114   :  { %v240_v47 = vpop.permute.xlu0 %239 }
 0x115   :  { %v242_v49 = vmul.f32 %v240_v47, %v229_v48 }
 0x117   :  { %244 = vrot.lane.b32.xlu1 %v242_v49, %s2008_s3 }
 0x11c   :  { %v235_v50 = vpop.permute.xlu0 %234 }
 0x11d   :  { %v237_v51 = vmul.f32 %v235_v50, %v229_v48 }
 0x189   :  { %v245_v52 = vpop.permute.xlu1 %244 }
 0x18a   :  { %v247_v53 = vadd.f32 %v245_v52, %v237_v51 }
 0x18c   :  { %1803 = vtanh.f32 %v247_v53 }
 0x192   :  { %v1804_v54 = vpop.eup %1803 }
 0x193   :  { %250 = vrot.lane.b32.xlu1 %v1804_v54, %s2008_s3 }
 0x205   :  { %v251_v55 = vpop.permute.xlu1 %250 }
 0x206   :  { %v253_v56 = vmul.f32 %v251_v55, %v229_v48 }
 0x208   :  { %260 = vrot.lane.b32.xlu2 %v253_v56, %s2009_s15 }
 0x210   :  { %255 = vrot.lane.b32.xlu2 %v247_v53, %s2010_s16 }
 0x262   :  { %v261_v57 = vpop.permute.xlu2 %260 }
 0x263   :  { %263 = vst.msk [vmem:[#allocation4] sm:$0x3] %vm178_vm0, %v261_v57 }
 0x264   :  { %264 = vst.msk [vmem:[#allocation3] sm:$0x3] %vm178_vm0, %v261_v57 }
 0x26a   :  { %v267_v58 = vld [vmem:[#allocation4] sm:$0x3]  ;;  %v256_v59 = vpop.permute.xlu2 %255 }
 0x26b   :  { %258 = vst.msk [vmem:[#allocation5] sm:$0x3] %vm178_vm0, %v256_v59  ;;  %1750 = vmatmul.msk.f32.vlgmr.msra.gmra.mxu3 %vm187_vm3, %v267_v58  ;;  %v436_v58 = vld [vmem:[#allocation2 + $0x6] sm:$0x3] }
 0x272   :  { %v316_v60 = vld [vmem:[#allocation5] sm:$0x3] }
 0x273   :  { %318 = vrot.lane.b32.xlu1 %v316_v60, %s2008_s3 }
 0x2e5   :  { %v319_v17 = vpop.permute.xlu1 %318 }
 0x2ee   :  { %v292_v62 = vpop.f32.mrf.mxu3 }
 0x2ef   :  { %v295_v63 = vadd.f32 %v292_v62, %v266_v61 }
 0x2f1   :  { %1805 = vtanh.f32 %v295_v63  ;;  %v1751_v2 = vmul.f32 -1.442695, %v295_v63 }
 0x2f3   :  { %1807 = vpow2.f32 %v1751_v2 }
 0x2f7   :  { %v1806_v1 = vpop.eup %1805 }
 0x2f8   :  { %323 = vrot.lane.b32.xlu0 %v1806_v1, %s2008_s3 }
 0x2f9   :  { %v1808_v3 = vpop.eup %1807 }
 0x2fa   :  { %v299_v4 = vadd.f32 1.0, %v1808_v3 }
 0x2fc   :  { %1809 = vrcp.f32 %v299_v4  ;;  %v311_v10 = vand.u32 2147483648, %v299_v4  ;;  %vm305_vm9 = vweird.f32 %v299_v4  ;;  %v309_v11 = vand.u32 2147483647, %v299_v4 }
 0x2fe   :  { %v312_v13 = vor.u32 1.1754944e-38, %v311_v10  ;;  %vm310_vm11 = vcmp.eq.f32.partialorder %v309_v11, 8.507059e+37 }
 0x302   :  { %v1810_v5 = vpop.eup %1809 }
 0x303   :  { %v301_v6 = vmul.f32 %v1810_v5, %v299_v4  ;;  %vm306_vm8 = vweird.f32 %v1810_v5 }
 0x304   :  { %vm307_vm10 = vmor %vm305_vm9, %vm306_vm8 }
 0x305   :  { %v302_v7 = vsub.f32 1.0, %v301_v6 }
 0x307   :  { %v303_v8 = vmul.f32 %v1810_v5, %v302_v7 }
 0x309   :  { %v304_v9 = vadd.f32 %v1810_v5, %v303_v8 }
 0x30b   :  { %v308_v12 = vsel %vm307_vm10, %v1810_v5, %v304_v9 }
 0x30c   :  { %v313_v15 = vsel %vm310_vm11, %v312_v13, %v308_v12 }
 0x30d   :  { %v321_v18 = vmul.f32 %v319_v17, %v313_v15 }
 0x36a   :  { %v324_v14 = vpop.permute.xlu0 %323 }
 0x36b   :  { %v326_v16 = vmul.f32 %v324_v14, %v313_v15 }
 0x36d   :  { %328 = vrot.lane.b32.xlu2 %v326_v16, %s2008_s3 }
 0x3c7   :  { %v329_v19 = vpop.permute.xlu2 %328 }
 0x3c8   :  { %v331_v20 = vadd.f32 %v329_v19, %v321_v18 }
 0x3ca   :  { %1811 = vtanh.f32 %v331_v20  ;;  %339 = vrot.lane.b32.xlu2 %v331_v20, %s2010_s16 }
 0x3d0   :  { %v1812_v21 = vpop.eup %1811 }
 0x3d1   :  { %334 = vrot.lane.b32.xlu0 %v1812_v21, %s2008_s3 }
 0x424   :  { %v340_v22 = vpop.permute.xlu2 %339 }
 0x425   :  { %342 = vst.msk [vmem:[#allocation5] sm:$0x3] %vm178_vm0, %v340_v22 }
 0x42c   :  { %v401_v25 = vld [vmem:[#allocation5] sm:$0x3] }
 0x443   :  { %v335_v23 = vpop.permute.xlu0 %334 }
 0x444   :  { %v337_v24 = vmul.f32 %v335_v23, %v313_v15 }
 0x446   :  { %344 = vrot.lane.b32.xlu1 %v337_v24, %s2009_s15 }
 0x44e   :  { %403 = vrot.lane.b32.xlu1 %v401_v25, %s2008_s3  ;;  %v521_v25 = vld [vmem:[#allocation2 + $0x8] sm:$0x3] }
 0x4b8   :  { %v345_v26 = vpop.permute.xlu1 %344 }
 0x4b9   :  { %347 = vst.msk [vmem:[#allocation4] sm:$0x3] %vm178_vm0, %v345_v26 }
 0x4ba   :  { %349 = vst.msk [vmem:[#allocation3 + $0x2] sm:$0x3] %vm178_vm0, %v345_v26 }
 0x4c0   :  { %v352_v27 = vld [vmem:[#allocation4] sm:$0x3]  ;;  %v404_v47 = vpop.permute.xlu1 %403 }
 0x4c1   :  { %1752 = vmatmul.msk.f32.vlgmr.msrb.gmra.mxu0 %vm187_vm3, %v352_v27 }
 0x53e   :  { %v377_v29 = vpop.f32.mrf.mxu0 }
 0x53f   :  { %v380_v30 = vadd.f32 %v377_v29, %v351_v28 }
 0x541   :  { %1813 = vtanh.f32 %v380_v30  ;;  %v1753_v32 = vmul.f32 -1.442695, %v380_v30 }
 0x543   :  { %1815 = vpow2.f32 %v1753_v32 }
 0x547   :  { %v1814_v31 = vpop.eup %1813 }
 0x548   :  { %408 = vrot.lane.b32.xlu0 %v1814_v31, %s2008_s3 }
 0x549   :  { %v1816_v33 = vpop.eup %1815 }
 0x54a   :  { %v384_v34 = vadd.f32 1.0, %v1816_v33 }
 0x54c   :  { %1817 = vrcp.f32 %v384_v34  ;;  %v396_v40 = vand.u32 2147483648, %v384_v34  ;;  %vm390_vm13 = vweird.f32 %v384_v34  ;;  %v394_v41 = vand.u32 2147483647, %v384_v34 }
 0x54e   :  { %v397_v43 = vor.u32 1.1754944e-38, %v396_v40  ;;  %vm395_vm15 = vcmp.eq.f32.partialorder %v394_v41, 8.507059e+37 }
 0x552   :  { %v1818_v35 = vpop.eup %1817 }
 0x553   :  { %v386_v36 = vmul.f32 %v1818_v35, %v384_v34  ;;  %vm391_vm12 = vweird.f32 %v1818_v35 }
 0x554   :  { %vm392_vm14 = vmor %vm390_vm13, %vm391_vm12 }
 0x555   :  { %v387_v37 = vsub.f32 1.0, %v386_v36 }
 0x557   :  { %v388_v38 = vmul.f32 %v1818_v35, %v387_v37 }
 0x559   :  { %v389_v39 = vadd.f32 %v1818_v35, %v388_v38 }
 0x55b   :  { %v393_v42 = vsel %vm392_vm14, %v1818_v35, %v389_v39 }
 0x55c   :  { %v398_v45 = vsel %vm395_vm15, %v397_v43, %v393_v42 }
 0x55d   :  { %v406_v48 = vmul.f32 %v404_v47, %v398_v45 }
 0x5ba   :  { %v409_v44 = vpop.permute.xlu0 %408 }
 0x5bb   :  { %v411_v46 = vmul.f32 %v409_v44, %v398_v45 }
 0x5bd   :  { %413 = vrot.lane.b32.xlu2 %v411_v46, %s2008_s3 }
 0x617   :  { %v414_v49 = vpop.permute.xlu2 %413 }
 0x618   :  { %v416_v50 = vadd.f32 %v414_v49, %v406_v48 }
 0x61a   :  { %1819 = vtanh.f32 %v416_v50  ;;  %424 = vrot.lane.b32.xlu2 %v416_v50, %s2010_s16 }
 0x620   :  { %v1820_v51 = vpop.eup %1819 }
 0x621   :  { %419 = vrot.lane.b32.xlu0 %v1820_v51, %s2008_s3 }
 0x674   :  { %v425_v52 = vpop.permute.xlu2 %424 }
 0x675   :  { %427 = vst.msk [vmem:[#allocation5] sm:$0x3] %vm178_vm0, %v425_v52 }
 0x67c   :  { %v486_v55 = vld [vmem:[#allocation5] sm:$0x3] }
 0x693   :  { %v420_v53 = vpop.permute.xlu0 %419 }
 0x694   :  { %v422_v54 = vmul.f32 %v420_v53, %v398_v45 }
 0x696   :  { %429 = vrot.lane.b32.xlu1 %v422_v54, %s2009_s15 }
 0x69e   :  { %488 = vrot.lane.b32.xlu1 %v486_v55, %s2008_s3  ;;  %v606_v55 = vld [vmem:[#allocation2 + $0xa] sm:$0x3] }
 0x708   :  { %v430_v56 = vpop.permute.xlu1 %429 }
 0x709   :  { %432 = vst.msk [vmem:[#allocation4] sm:$0x3] %vm178_vm0, %v430_v56 }
 0x70a   :  { %434 = vst.msk [vmem:[#allocation3 + $0x4] sm:$0x3] %vm178_vm0, %v430_v56 }
 0x710   :  { %v437_v57 = vld [vmem:[#allocation4] sm:$0x3]  ;;  %v489_v14 = vpop.permute.xlu1 %488 }
 0x711   :  { %1754 = vmatmul.msk.f32.vlgmr.msrb.gmra.mxu1 %vm187_vm3, %v437_v57 }
 0x78e   :  { %v462_v59 = vpop.f32.mrf.mxu1 }
 0x78f   :  { %v465_v60 = vadd.f32 %v462_v59, %v436_v58 }
 0x791   :  { %1821 = vtanh.f32 %v465_v60  ;;  %v1755_v62 = vmul.f32 -1.442695, %v465_v60 }
 0x793   :  { %1823 = vpow2.f32 %v1755_v62 }
 0x797   :  { %v1822_v61 = vpop.eup %1821 }
 0x798   :  { %493 = vrot.lane.b32.xlu0 %v1822_v61, %s2008_s3 }
 0x799   :  { %v1824_v63 = vpop.eup %1823 }
 0x79a   :  { %v469_v1 = vadd.f32 1.0, %v1824_v63 }
 0x79c   :  { %1825 = vrcp.f32 %v469_v1  ;;  %v481_v7 = vand.u32 2147483648, %v469_v1  ;;  %vm475_vm2 = vweird.f32 %v469_v1  ;;  %v479_v8 = vand.u32 2147483647, %v469_v1 }
 0x79e   :  { %v482_v10 = vor.u32 1.1754944e-38, %v481_v7  ;;  %vm480_vm5 = vcmp.eq.f32.partialorder %v479_v8, 8.507059e+37 }
 0x7a2   :  { %v1826_v2 = vpop.eup %1825 }
 0x7a3   :  { %v471_v3 = vmul.f32 %v1826_v2, %v469_v1  ;;  %vm476_vm1 = vweird.f32 %v1826_v2 }
 0x7a4   :  { %vm477_vm4 = vmor %vm475_vm2, %vm476_vm1 }
 0x7a5   :  { %v472_v4 = vsub.f32 1.0, %v471_v3 }
 0x7a7   :  { %v473_v5 = vmul.f32 %v1826_v2, %v472_v4 }
 0x7a9   :  { %v474_v6 = vadd.f32 %v1826_v2, %v473_v5 }
 0x7ab   :  { %v478_v9 = vsel %vm477_vm4, %v1826_v2, %v474_v6 }
 0x7ac   :  { %v483_v12 = vsel %vm480_vm5, %v482_v10, %v478_v9 }
 0x7ad   :  { %v491_v15 = vmul.f32 %v489_v14, %v483_v12 }
 0x80a   :  { %v494_v11 = vpop.permute.xlu0 %493 }
 0x80b   :  { %v496_v13 = vmul.f32 %v494_v11, %v483_v12 }
 0x80d   :  { %498 = vrot.lane.b32.xlu2 %v496_v13, %s2008_s3 }
 0x867   :  { %v499_v16 = vpop.permute.xlu2 %498 }
 0x868   :  { %v501_v17 = vadd.f32 %v499_v16, %v491_v15 }
 0x86a   :  { %1827 = vtanh.f32 %v501_v17  ;;  %509 = vrot.lane.b32.xlu2 %v501_v17, %s2010_s16 }
 0x870   :  { %v1828_v18 = vpop.eup %1827 }
 0x871   :  { %504 = vrot.lane.b32.xlu0 %v1828_v18, %s2008_s3 }
 0x8c4   :  { %v510_v19 = vpop.permute.xlu2 %509 }
 0x8c5   :  { %512 = vst.msk [vmem:[#allocation5] sm:$0x3] %vm178_vm0, %v510_v19 }
 0x8cc   :  { %v571_v22 = vld [vmem:[#allocation5] sm:$0x3] }
 0x8e3   :  { %v505_v20 = vpop.permute.xlu0 %504 }
 0x8e4   :  { %v507_v21 = vmul.f32 %v505_v20, %v483_v12 }
 0x8e6   :  { %514 = vrot.lane.b32.xlu1 %v507_v21, %s2009_s15 }
 0x8ee   :  { %573 = vrot.lane.b32.xlu1 %v571_v22, %s2008_s3  ;;  %v691_v22 = vld [vmem:[#allocation2 + $0xc] sm:$0x3] }
 0x958   :  { %v515_v23 = vpop.permute.xlu1 %514 }
 0x959   :  { %517 = vst.msk [vmem:[#allocation4] sm:$0x3] %vm178_vm0, %v515_v23 }
 0x95a   :  { %519 = vst.msk [vmem:[#allocation3 + $0x6] sm:$0x3] %vm178_vm0, %v515_v23 }
 0x960   :  { %v522_v24 = vld [vmem:[#allocation4] sm:$0x3]  ;;  %v574_v44 = vpop.permute.xlu1 %573 }
 0x961   :  { %1756 = vmatmul.msk.f32.vlgmr.msrb.gmra.mxu2 %vm187_vm3, %v522_v24 }
 0x9e4   :  { %v547_v26 = vpop.f32.mrf.mxu2 }
 0x9e5   :  { %v550_v27 = vadd.f32 %v547_v26, %v521_v25 }
 0x9e7   :  { %1829 = vtanh.f32 %v550_v27  ;;  %v1757_v29 = vmul.f32 -1.442695, %v550_v27 }
 0x9e9   :  { %1831 = vpow2.f32 %v1757_v29 }
 0x9ed   :  { %v1830_v28 = vpop.eup %1829 }
 0x9ee   :  { %578 = vrot.lane.b32.xlu0 %v1830_v28, %s2008_s3 }
 0x9ef   :  { %v1832_v30 = vpop.eup %1831 }
 0x9f0   :  { %v554_v31 = vadd.f32 1.0, %v1832_v30 }
 0x9f2   :  { %1833 = vrcp.f32 %v554_v31  ;;  %v566_v37 = vand.u32 2147483648, %v554_v31  ;;  %vm560_vm7 = vweird.f32 %v554_v31  ;;  %v564_v38 = vand.u32 2147483647, %v554_v31 }
 0x9f4   :  { %v567_v40 = vor.u32 1.1754944e-38, %v566_v37  ;;  %vm565_vm9 = vcmp.eq.f32.partialorder %v564_v38, 8.507059e+37 }
 0x9f8   :  { %v1834_v32 = vpop.eup %1833 }
 0x9f9   :  { %v556_v33 = vmul.f32 %v1834_v32, %v554_v31  ;;  %vm561_vm6 = vweird.f32 %v1834_v32 }
 0x9fa   :  { %vm562_vm8 = vmor %vm560_vm7, %vm561_vm6 }
 0x9fb   :  { %v557_v34 = vsub.f32 1.0, %v556_v33 }
 0x9fd   :  { %v558_v35 = vmul.f32 %v1834_v32, %v557_v34 }
 0x9ff   :  { %v559_v36 = vadd.f32 %v1834_v32, %v558_v35 }
 0xa01   :  { %v563_v39 = vsel %vm562_vm8, %v1834_v32, %v559_v36  ;;  %vm885_vm8 = vcmask 1041409  }
 0xa02   :  { %v568_v42 = vsel %vm565_vm9, %v567_v40, %v563_v39  ;;  %vm888_vm9 = vcmask 1042434  }
 0xa03   :  { %v576_v45 = vmul.f32 %v574_v44, %v568_v42 }
 0xa60   :  { %v579_v41 = vpop.permute.xlu0 %578 }
 0xa61   :  { %v581_v43 = vmul.f32 %v579_v41, %v568_v42 }
 0xa63   :  { %583 = vrot.lane.b32.xlu2 %v581_v43, %s2008_s3 }
 0xabd   :  { %v584_v46 = vpop.permute.xlu2 %583 }
 0xabe   :  { %v586_v47 = vadd.f32 %v584_v46, %v576_v45 }
 0xac0   :  { %1835 = vtanh.f32 %v586_v47  ;;  %594 = vrot.lane.b32.xlu2 %v586_v47, %s2010_s16 }
 0xac6   :  { %v1836_v48 = vpop.eup %1835 }
 0xac7   :  { %589 = vrot.lane.b32.xlu0 %v1836_v48, %s2008_s3 }
 0xb1a   :  { %v595_v49 = vpop.permute.xlu2 %594 }
 0xb1b   :  { %597 = vst.msk [vmem:[#allocation5] sm:$0x3] %vm178_vm0, %v595_v49 }
 0xb22   :  { %v656_v52 = vld [vmem:[#allocation5] sm:$0x3] }
 0xb39   :  { %v590_v50 = vpop.permute.xlu0 %589 }
 0xb3a   :  { %v592_v51 = vmul.f32 %v590_v50, %v568_v42 }
 0xb3c   :  { %599 = vrot.lane.b32.xlu1 %v592_v51, %s2009_s15 }
 0xb44   :  { %658 = vrot.lane.b32.xlu1 %v656_v52, %s2008_s3  ;;  %v776_v52 = vld [vmem:[#allocation2 + $0xe] sm:$0x3] }
 0xbae   :  { %v600_v53 = vpop.permute.xlu1 %599 }
 0xbaf   :  { %602 = vst.msk [vmem:[#allocation4] sm:$0x3] %vm178_vm0, %v600_v53 }
 0xbb0   :  { %604 = vst.msk [vmem:[#allocation3 + $0x8] sm:$0x3] %vm178_vm0, %v600_v53 }
 0xbb6   :  { %v607_v54 = vld [vmem:[#allocation4] sm:$0x3]  ;;  %v659_v11 = vpop.permute.xlu1 %658 }
 0xbb7   :  { %1758 = vmatmul.msk.f32.vlgmr.msrb.gmra.mxu3 %vm187_vm3, %v607_v54 }
 0xc3a   :  { %v632_v56 = vpop.f32.mrf.mxu3 }
 0xc3b   :  { %v635_v57 = vadd.f32 %v632_v56, %v606_v55 }
 0xc3d   :  { %1837 = vtanh.f32 %v635_v57  ;;  %v1759_v59 = vmul.f32 -1.442695, %v635_v57 }
 0xc3f   :  { %1839 = vpow2.f32 %v1759_v59 }
 0xc43   :  { %v1838_v58 = vpop.eup %1837 }
 0xc44   :  { %663 = vrot.lane.b32.xlu0 %v1838_v58, %s2008_s3 }
 0xc45   :  { %v1840_v60 = vpop.eup %1839 }
 0xc46   :  { %v639_v61 = vadd.f32 1.0, %v1840_v60 }
 0xc48   :  { %1841 = vrcp.f32 %v639_v61  ;;  %v651_v4 = vand.u32 2147483648, %v639_v61  ;;  %vm645_vm11 = vweird.f32 %v639_v61  ;;  %v649_v5 = vand.u32 2147483647, %v639_v61 }
 0xc4a   :  { %v652_v7 = vor.u32 1.1754944e-38, %v651_v4  ;;  %vm650_vm13 = vcmp.eq.f32.partialorder %v649_v5, 8.507059e+37 }
 0xc4e   :  { %v1842_v62 = vpop.eup %1841 }
 0xc4f   :  { %v641_v63 = vmul.f32 %v1842_v62, %v639_v61  ;;  %vm646_vm10 = vweird.f32 %v1842_v62 }
 0xc50   :  { %vm647_vm12 = vmor %vm645_vm11, %vm646_vm10  ;;  %vm891_vm10 = vcmask 1043459   ;;  %vm894_vm11 = vcmask 1044484  }
 0xc51   :  { %v642_v1 = vsub.f32 1.0, %v641_v63 }
 0xc53   :  { %v643_v2 = vmul.f32 %v1842_v62, %v642_v1 }
 0xc55   :  { %v644_v3 = vadd.f32 %v1842_v62, %v643_v2 }
 0xc57   :  { %v648_v6 = vsel %vm647_vm12, %v1842_v62, %v644_v3  ;;  %vm897_vm12 = vcmask 1045509  }
 0xc58   :  { %v653_v9 = vsel %vm650_vm13, %v652_v7, %v648_v6  ;;  %vm900_vm13 = vcmask 1046534  }
 0xc59   :  { %v661_v12 = vmul.f32 %v659_v11, %v653_v9 }
 0xcb6   :  { %v664_v8 = vpop.permute.xlu0 %663 }
 0xcb7   :  { %v666_v10 = vmul.f32 %v664_v8, %v653_v9 }
 0xcb9   :  { %668 = vrot.lane.b32.xlu2 %v666_v10, %s2008_s3 }
 0xd13   :  { %v669_v13 = vpop.permute.xlu2 %668 }
 0xd14   :  { %v671_v14 = vadd.f32 %v669_v13, %v661_v12 }
 0xd16   :  { %1843 = vtanh.f32 %v671_v14  ;;  %679 = vrot.lane.b32.xlu2 %v671_v14, %s2010_s16 }
 0xd1c   :  { %v1844_v15 = vpop.eup %1843 }
 0xd1d   :  { %674 = vrot.lane.b32.xlu0 %v1844_v15, %s2008_s3 }
 0xd70   :  { %v680_v16 = vpop.permute.xlu2 %679 }
 0xd71   :  { %682 = vst.msk [vmem:[#allocation5] sm:$0x3] %vm178_vm0, %v680_v16  ;;  %v871_v16 = vld [vmem:[#allocation6 + $0x18] sm:$0xff] }
 0xd72   :  { %919 = vmatpush.msra.mxu2 %v871_v16  ;;  %1002 = vmatpush.msra.mxu3 %v871_v16 }
 0xd78   :  { %v741_v19 = vld [vmem:[#allocation5] sm:$0x3] }
 0xd8f   :  { %v675_v17 = vpop.permute.xlu0 %674 }
 0xd90   :  { %v677_v18 = vmul.f32 %v675_v17, %v653_v9  ;;  %v870_v17 = vld [vmem:[#allocation6 + $0x10] sm:$0xff] }
 0xd91   :  { %920 = vmatpush.msra.mxu2 %v870_v17  ;;  %1003 = vmatpush.msra.mxu3 %v870_v17 }
 0xd92   :  { %684 = vrot.lane.b32.xlu1 %v677_v18, %s2009_s15  ;;  %v869_v18 = vld [vmem:[#allocation6 + $0x8] sm:$0xff] }
 0xd93   :  { %921 = vmatpush.msra.mxu2 %v869_v18  ;;  %1004 = vmatpush.msra.mxu3 %v869_v18 }
 0xd9a   :  { %743 = vrot.lane.b32.xlu1 %v741_v19, %s2008_s3  ;;  %v868_v19 = vld [vmem:[#allocation6] sm:$0xff] }
 0xd9b   :  { %922 = vmatpush.msra.mxu2 %v868_v19  ;;  %1005 = vmatpush.msra.mxu3 %v868_v19 }
 0xe04   :  { %v685_v20 = vpop.permute.xlu1 %684 }
 0xe05   :  { %687 = vst.msk [vmem:[#allocation4] sm:$0x3] %vm178_vm0, %v685_v20 }
 0xe06   :  { %689 = vst.msk [vmem:[#allocation3 + $0xa] sm:$0x3] %vm178_vm0, %v685_v20  ;;  %v2182_v20 = vld [vmem:[#allocation9 + $0x18] sm:$0xff] }
 0xe07   :  { %1056 = vmatpush.msrb.mxu0 %v2182_v20  ;;  %1138 = vmatpush.msrb.mxu1 %v2182_v20 }
 0xe08   :  { %1220 = vmatpush.msrb.mxu2 %v2182_v20  ;;  %1302 = vmatpush.msrb.mxu3 %v2182_v20 }
 0xe0c   :  { %v692_v21 = vld [vmem:[#allocation4] sm:$0x3]  ;;  %v744_v41 = vpop.permute.xlu1 %743 }
 0xe0d   :  { %1760 = vmatmul.msk.f32.vlgmr.msra.gmra.mxu0 %vm187_vm3, %v692_v21  ;;  %v2184_v21 = vld [vmem:[#allocation9 + $0x10] sm:$0xff] }
 0xe0e   :  { %1057 = vmatpush.msrb.mxu0 %v2184_v21  ;;  %1139 = vmatpush.msrb.mxu1 %v2184_v21 }
 0xe0f   :  { %1221 = vmatpush.msrb.mxu2 %v2184_v21  ;;  %1303 = vmatpush.msrb.mxu3 %v2184_v21 }
 0xe8a   :  { %v717_v23 = vpop.f32.mrf.mxu0 }
 0xe8b   :  { %v720_v24 = vadd.f32 %v717_v23, %v691_v22  ;;  %v2188_v23 = vld [vmem:[#allocation9 + $0x8] sm:$0xff] }
 0xe8c   :  { %1058 = vmatpush.msrb.mxu0 %v2188_v23  ;;  %1140 = vmatpush.msrb.mxu1 %v2188_v23 }
 0xe8d   :  { %1845 = vtanh.f32 %v720_v24  ;;  %v1761_v26 = vmul.f32 -1.442695, %v720_v24  ;;  %v2194_v24 = vld [vmem:[#allocation9] sm:$0xff]  ;;  %1222 = vmatpush.msrb.mxu2 %v2188_v23  ;;  %1304 = vmatpush.msrb.mxu3 %v2188_v23 }
 0xe8e   :  { %1059 = vmatpush.msrb.mxu0 %v2194_v24  ;;  %1141 = vmatpush.msrb.mxu1 %v2194_v24 }
 0xe8f   :  { %1847 = vpow2.f32 %v1761_v26  ;;  %1223 = vmatpush.msrb.mxu2 %v2194_v24  ;;  %1305 = vmatpush.msrb.mxu3 %v2194_v24  ;;  %v862_v26 = vld [vmem:[#allocation3 + $0x4] sm:$0x1] }
 0xe90   :  { %1384 = vmatpush.msra.mxu0 %v2182_v20 }
 0xe92   :  { %1385 = vmatpush.msra.mxu0 %v2184_v21 }
 0xe93   :  { %v1846_v25 = vpop.eup %1845 }
 0xe94   :  { %748 = vrot.lane.b32.xlu0 %v1846_v25, %s2008_s3  ;;  %1386 = vmatpush.msra.mxu0 %v2188_v23  ;;  %v861_v25 = vld [vmem:[#allocation3 + $0x2] sm:$0x1] }
 0xe95   :  { %v1848_v27 = vpop.eup %1847 }
 0xe96   :  { %v724_v28 = vadd.f32 1.0, %v1848_v27  ;;  %1387 = vmatpush.msra.mxu0 %v2194_v24  ;;  %v951_v27 = vld [vmem:[#allocation3 + $0x3] sm:$0x1] }
 0xe98   :  { %1849 = vrcp.f32 %v724_v28  ;;  %v736_v34 = vand.u32 2147483648, %v724_v28  ;;  %vm730_vm15 = vweird.f32 %v724_v28  ;;  %v734_v35 = vand.u32 2147483647, %v724_v28 }
 0xe9a   :  { %v737_v37 = vor.u32 1.1754944e-38, %v736_v34  ;;  %vm735_vm2 = vcmp.eq.f32.partialorder %v734_v35, 8.507059e+37  ;;  %v860_v34 = vld [vmem:[#allocation3] sm:$0x1]  ;;  %v863_v35 = vld [vmem:[#allocation3 + $0x6] sm:$0x1] }
 0xe9e   :  { %v1850_v29 = vpop.eup %1849 }
 0xe9f   :  { %v726_v30 = vmul.f32 %v1850_v29, %v724_v28  ;;  %vm731_vm14 = vweird.f32 %v1850_v29  ;;  %v952_v28 = vld [vmem:[#allocation3 + $0x5] sm:$0x1] }
 0xea0   :  { %vm732_vm1 = vmor %vm730_vm15, %vm731_vm14  ;;  %vm903_vm14 = vcmask 1047559  }
 0xea1   :  { %v727_v31 = vsub.f32 1.0, %v726_v30 }
 0xea3   :  { %v728_v32 = vmul.f32 %v1850_v29, %v727_v31  ;;  %v887_v31 = vrot.slane %v862_v26, 6 }
 0xea5   :  { %v729_v33 = vadd.f32 %v1850_v29, %v728_v32  ;;  %v974_v32 = vrot.slane %v951_v27, 7 }
 0xea7   :  { %v733_v36 = vsel %vm732_vm1, %v1850_v29, %v729_v33  ;;  %v884_v29 = vrot.slane %v861_v25, 7  ;;  %v976_v33 = vrot.slane %v952_v28, 6 }
 0xea8   :  { %v738_v39 = vsel %vm735_vm2, %v737_v37, %v733_v36  ;;  %v953_v36 = vld [vmem:[#allocation3 + $0x7] sm:$0x1]  ;;  %v864_v37 = vld [vmem:[#allocation3 + $0x8] sm:$0x1] }
 0xea9   :  { %v746_v42 = vmul.f32 %v744_v41, %v738_v39  ;;  %v955_v41 = vld [vmem:[#allocation3 + $0xb] sm:$0x1] }
 0xf06   :  { %v749_v38 = vpop.permute.xlu0 %748 }
 0xf07   :  { %v751_v40 = vmul.f32 %v749_v38, %v738_v39  ;;  %v950_v38 = vld [vmem:[#allocation3 + $0x1] sm:$0x1] }
 0xf09   :  { %753 = vrot.lane.b32.xlu2 %v751_v40, %s2008_s3  ;;  %v865_v40 = vld [vmem:[#allocation3 + $0xa] sm:$0x1] }
 0xf63   :  { %v754_v43 = vpop.permute.xlu2 %753 }
 0xf64   :  { %v756_v44 = vadd.f32 %v754_v43, %v746_v42  ;;  %v886_v43 = vsel %vm885_vm8, %v884_v29, %v860_v34 }
 0xf66   :  { %1851 = vtanh.f32 %v756_v44  ;;  %764 = vrot.lane.b32.xlu2 %v756_v44, %s2010_s16  ;;  %v890_v44 = vrot.slane %v863_v35, 5 }
 0xf6c   :  { %v1852_v45 = vpop.eup %1851 }
 0xf6d   :  { %759 = vrot.lane.b32.xlu0 %v1852_v45, %s2008_s3 }
 0xfc0   :  { %v765_v46 = vpop.permute.xlu2 %764 }
 0xfc1   :  { %767 = vst.msk [vmem:[#allocation5] sm:$0x3] %vm178_vm0, %v765_v46  ;;  %v978_v46 = vrot.slane %v953_v36, 5 }
 0xfc8   :  { %v826_v49 = vld [vmem:[#allocation5] sm:$0x3] }
 0xfdf   :  { %v760_v47 = vpop.permute.xlu0 %759 }
 0xfe0   :  { %v762_v48 = vmul.f32 %v760_v47, %v738_v39  ;;  %v954_v39 = vld [vmem:[#allocation3 + $0x9] sm:$0x1]  ;;  %v893_v47 = vrot.slane %v864_v37, 4 }
 0xfe2   :  { %769 = vrot.lane.b32.xlu1 %v762_v48, %s2009_s15  ;;  %v975_v48 = vsel %vm885_vm8, %v974_v32, %v950_v38 }
 0xfea   :  { %828 = vrot.lane.b32.xlu1 %v826_v49, %s2008_s3  ;;  %v980_v49 = vrot.slane %v954_v39, 4 }
0x1054   :  { %v770_v50 = vpop.permute.xlu1 %769 }
0x1055   :  { %772 = vst.msk [vmem:[#allocation4] sm:$0x3] %vm178_vm0, %v770_v50 }
0x1056   :  { %774 = vst.msk [vmem:[#allocation3 + $0xc] sm:$0x3] %vm178_vm0, %v770_v50  ;;  %v889_v50 = vsel %vm888_vm9, %v887_v31, %v886_v43 }
0x105c   :  { %v777_v51 = vld [vmem:[#allocation4] sm:$0x3]  ;;  %v829_v8 = vpop.permute.xlu1 %828 }
0x105d   :  { %1762 = vmatmul.msk.f32.vlgmr.msra.gmra.mxu1 %vm187_vm3, %v777_v51  ;;  %v866_v42 = vld [vmem:[#allocation3 + $0xc] sm:$0x1]  ;;  %v956_v45 = vld [vmem:[#allocation3 + $0xd] sm:$0x1]  ;;  %v896_v51 = vrot.slane %v865_v40, 3 }
0x105e   :  { %1466 = vmatpush.msra.mxu1 %v2182_v20 }
0x1060   :  { %1467 = vmatpush.msra.mxu1 %v2184_v21 }
0x1062   :  { %1468 = vmatpush.msra.mxu1 %v2188_v23 }
0x1064   :  { %1469 = vmatpush.msra.mxu1 %v2194_v24 }
0x10da   :  { %v802_v53 = vpop.f32.mrf.mxu1 }
0x10db   :  { %v805_v54 = vadd.f32 %v802_v53, %v776_v52  ;;  %v982_v52 = vrot.slane %v955_v41, 3  ;;  %v977_v53 = vsel %vm888_vm9, %v976_v33, %v975_v48 }
0x10dd   :  { %1853 = vtanh.f32 %v805_v54  ;;  %v1763_v56 = vmul.f32 -1.442695, %v805_v54  ;;  %v984_v54 = vrot.slane %v956_v45, 2 }
0x10df   :  { %1855 = vpow2.f32 %v1763_v56  ;;  %v979_v56 = vsel %vm891_vm10, %v978_v46, %v977_v53 }
0x10e3   :  { %v1854_v55 = vpop.eup %1853 }
0x10e4   :  { %833 = vrot.lane.b32.xlu0 %v1854_v55, %s2008_s3  ;;  %v892_v55 = vsel %vm891_vm10, %v890_v44, %v889_v50 }
0x10e5   :  { %v1856_v57 = vpop.eup %1855 }
0x10e6   :  { %v809_v58 = vadd.f32 1.0, %v1856_v57 }
0x10e8   :  { %1857 = vrcp.f32 %v809_v58  ;;  %v821_v1 = vand.u32 2147483648, %v809_v58  ;;  %vm815_vm5 = vweird.f32 %v809_v58  ;;  %v819_v2 = vand.u32 2147483647, %v809_v58 }
0x10ea   :  { %v822_v4 = vor.u32 1.1754944e-38, %v821_v1  ;;  %vm820_vm7 = vcmp.eq.f32.partialorder %v819_v2, 8.507059e+37 }
0x10ee   :  { %v1858_v59 = vpop.eup %1857 }
0x10ef   :  { %v811_v60 = vmul.f32 %v1858_v59, %v809_v58  ;;  %vm816_vm4 = vweird.f32 %v1858_v59  ;;  %v895_v58 = vsel %vm894_vm11, %v893_v47, %v892_v55 }
0x10f0   :  { %vm817_vm6 = vmor %vm815_vm5, %vm816_vm4 }
0x10f1   :  { %v812_v61 = vsub.f32 1.0, %v811_v60  ;;  %v981_v60 = vsel %vm894_vm11, %v980_v49, %v979_v56 }
0x10f3   :  { %v813_v62 = vmul.f32 %v1858_v59, %v812_v61  ;;  %v898_v61 = vsel %vm897_vm12, %v896_v51, %v895_v58 }
0x10f5   :  { %v814_v63 = vadd.f32 %v1858_v59, %v813_v62 }
0x10f7   :  { %v818_v3 = vsel %vm817_vm6, %v1858_v59, %v814_v63  ;;  %v983_v63 = vsel %vm897_vm12, %v982_v52, %v981_v60 }
0x10f8   :  { %v823_v6 = vsel %vm820_vm7, %v822_v4, %v818_v3  ;;  %v985_v4 = vsel %vm900_vm13, %v984_v54, %v983_v63 }
0x10f9   :  { %v831_v9 = vmul.f32 %v829_v8, %v823_v6  ;;  %v1795_v8 = vld [vmem:[%s2335_s6] ss:$0 sm:$0xff] }
0x1156   :  { %v834_v5 = vpop.permute.xlu0 %833 }
0x1157   :  { %v836_v7 = vmul.f32 %v834_v5, %v823_v6 }
0x1159   :  { %838 = vrot.lane.b32.xlu2 %v836_v7, %s2008_s3  ;;  %v1794_v7 = vld [vmem:[%s2335_s6] ss:$0 sm:$0xff] }
0x11b3   :  { %v839_v10 = vpop.permute.xlu2 %838 }
0x11b4   :  { %v841_v11 = vadd.f32 %v839_v10, %v831_v9 }
0x11b6   :  { %1859 = vtanh.f32 %v841_v11  ;;  %849 = vrot.lane.b32.xlu2 %v841_v11, %s2010_s16 }
0x11bc   :  { %v1860_v12 = vpop.eup %1859 }
0x11bd   :  { %844 = vrot.lane.b32.xlu0 %v1860_v12, %s2008_s3 }
0x1210   :  { %v850_v13 = vpop.permute.xlu2 %849 }
0x1211   :  { %852 = vst.msk [vmem:[#allocation5] sm:$0x3] %vm178_vm0, %v850_v13 }
0x1212   :  { %1034 = vst.msk [vmem:[#allocation5] sm:$0x3] %vm178_vm0, %v2007_v0 }
0x1219   :  { %v1085_v22 = vld [vmem:[#allocation5] sm:$0x3] }
0x122f   :  { %v845_v14 = vpop.permute.xlu0 %844 }
0x1230   :  { %v847_v15 = vmul.f32 %v845_v14, %v823_v6 }
0x1232   :  { %854 = vrot.lane.b32.xlu1 %v847_v15, %s2009_s15 }
0x123a   :  { %1087 = vrot.lane.b32.xlu1 %v1085_v22, %s2008_s3 }
0x12a4   :  { %v855_v30 = vpop.permute.xlu1 %854 }
0x12a5   :  { %857 = vst.msk [vmem:[#allocation4] sm:$0x3] %vm178_vm0, %v855_v30 }
0x12a6   :  { %859 = vst.msk [vmem:[#allocation3 + $0xe] sm:$0x3] %vm178_vm0, %v855_v30 }
0x12a7   :  { %1033 = vst.msk [vmem:[#allocation4] sm:$0x3] %vm178_vm0, %v2007_v0  ;;  %v899_v0 = vrot.slane %v866_v42, 2 }
0x12a9   :  { %v901_v3 = vsel %vm900_vm13, %v899_v0, %v898_v61 }
0x12ac   :  { %v1088_v46 = vpop.permute.xlu1 %1087 }
0x12ad   :  { %v867_v57 = vld [vmem:[#allocation3 + $0xe] sm:$0x1]  ;;  %v957_v59 = vld [vmem:[#allocation3 + $0xf] sm:$0x1] }
0x12ae   :  { %v902_v62 = vrot.slane %v867_v57, 1  ;;  %v986_v1 = vrot.slane %v957_v59, 1  ;;  %v1036_v2 = vld [vmem:[#allocation4] sm:$0x3] }
0x12af   :  { %1766 = vmatmul.msk.f32.vlgmr.msrb.gmra.mxu0 %vm187_vm3, %v1036_v2 }
0x12b0   :  { %v904_v5 = vsel %vm903_vm14, %v902_v62, %v901_v3  ;;  %v987_v6 = vsel %vm903_vm14, %v986_v1, %v985_v4 }
0x12b1   :  { %1764 = vmatmul.msk.f32.vlgmr.msra.gmra.mxu2 %vm187_vm3, %v904_v5  ;;  %1765 = vmatmul.msk.f32.vlgmr.msra.gmra.mxu3 %vm187_vm3, %v987_v6 }
0x12b2   :  { %1548 = vmatpush.msra.mxu2 %v2182_v20  ;;  %1630 = vmatpush.msra.mxu3 %v2182_v20 }
0x12b4   :  { %1549 = vmatpush.msra.mxu2 %v2184_v21  ;;  %1631 = vmatpush.msra.mxu3 %v2184_v21 }
0x12b6   :  { %1550 = vmatpush.msra.mxu2 %v2188_v23  ;;  %1632 = vmatpush.msra.mxu3 %v2188_v23 }
0x12b8   :  { %1551 = vmatpush.msra.mxu2 %v2194_v24  ;;  %1633 = vmatpush.msra.mxu3 %v2194_v24 }
0x132c   :  { %v1061_v22 = vpop.f32.mrf.mxu0 }
0x1334   :  { %v924_v9 = vpop.f32.mrf.mxu2  ;;  %v1007_v10 = vpop.f32.mrf.mxu3 }
0x1335   :  { %v925_v11 = vadd.f32 %v1794_v7, %v924_v9  ;;  %v1008_v12 = vadd.f32 %v1795_v8, %v1007_v10 }
0x1337   :  { %v928_v13 = vrot.slane %v925_v11, 1  ;;  %v929_v14 = vrot.slane %v925_v11, 2  ;;  %v930_v15 = vrot.slane %v925_v11, 3  ;;  %942 = vst [vmem:[#allocation2] sm:$0x1] %v925_v11  ;;  %v931_v16 = vrot.slane %v925_v11, 4 }
0x1338   :  { %1025 = vst [vmem:[#allocation2 + $0x1] sm:$0x1] %v1008_v12  ;;  %v932_v17 = vrot.slane %v925_v11, 5  ;;  %v933_v18 = vrot.slane %v925_v11, 6  ;;  %v934_v19 = vrot.slane %v925_v11, 7  ;;  %v1011_v20 = vrot.slane %v1008_v12, 1 }
0x1339   :  { %943 = vst [vmem:[#allocation2 + $0x2] sm:$0x1] %v928_v13  ;;  %v1012_v21 = vrot.slane %v1008_v12, 2  ;;  %v1013_v23 = vrot.slane %v1008_v12, 3  ;;  %v1014_v24 = vrot.slane %v1008_v12, 4  ;;  %v1015_v26 = vrot.slane %v1008_v12, 5 }
0x133a   :  { %944 = vst [vmem:[#allocation2 + $0x4] sm:$0x1] %v929_v14  ;;  %v1016_v28 = vrot.slane %v1008_v12, 6  ;;  %v1017_v29 = vrot.slane %v1008_v12, 7 }
0x133b   :  { %945 = vst [vmem:[#allocation2 + $0x6] sm:$0x1] %v930_v15 }
0x133c   :  { %946 = vst [vmem:[#allocation2 + $0x8] sm:$0x1] %v931_v16 }
0x133d   :  { %947 = vst [vmem:[#allocation2 + $0xa] sm:$0x1] %v932_v17 }
0x133e   :  { %948 = vst [vmem:[#allocation2 + $0xc] sm:$0x1] %v933_v18 }
0x133f   :  { %949 = vst [vmem:[#allocation2 + $0xe] sm:$0x1] %v934_v19  ;;  %v1035_v25 = vld [vmem:[#allocation2] sm:$0x3] }
0x1340   :  { %1026 = vst [vmem:[#allocation2 + $0x3] sm:$0x1] %v1011_v20  ;;  %v1064_v27 = vadd.f32 %v1061_v22, %v1035_v25 }
0x1341   :  { %1027 = vst [vmem:[#allocation2 + $0x5] sm:$0x1] %v1012_v21 }
0x1342   :  { %1028 = vst [vmem:[#allocation2 + $0x7] sm:$0x1] %v1013_v23  ;;  %1861 = vtanh.f32 %v1064_v27  ;;  %v1767_v31 = vmul.f32 -1.442695, %v1064_v27 }
0x1343   :  { %1029 = vst [vmem:[#allocation2 + $0x9] sm:$0x1] %v1014_v24 }
0x1344   :  { %1030 = vst [vmem:[#allocation2 + $0xb] sm:$0x1] %v1015_v26  ;;  %1863 = vpow2.f32 %v1767_v31 }
0x1345   :  { %1031 = vst [vmem:[#allocation2 + $0xd] sm:$0x1] %v1016_v28 }
0x1346   :  { %1032 = vst [vmem:[#allocation2 + $0xf] sm:$0x1] %v1017_v29 }
0x1347   :  { %v1117_v56 = vld [vmem:[#allocation2 + $0x2] sm:$0x3] }
0x1348   :  { %v1862_v30 = vpop.eup %1861  ;;  %v1199_v23 = vld [vmem:[#allocation2 + $0x4] sm:$0x3] }
0x1349   :  { %1092 = vrot.lane.b32.xlu0 %v1862_v30, %s2008_s3 }
0x134a   :  { %v1864_v32 = vpop.eup %1863 }
0x134b   :  { %v1068_v33 = vadd.f32 1.0, %v1864_v32 }
0x134d   :  { %1865 = vrcp.f32 %v1068_v33  ;;  %v1080_v39 = vand.u32 2147483648, %v1068_v33  ;;  %vm1074_vm1 = vweird.f32 %v1068_v33  ;;  %v1078_v40 = vand.u32 2147483647, %v1068_v33 }
0x134f   :  { %v1081_v42 = vor.u32 1.1754944e-38, %v1080_v39  ;;  %vm1079_vm4 = vcmp.eq.f32.partialorder %v1078_v40, 8.507059e+37 }
0x1353   :  { %v1866_v34 = vpop.eup %1865 }
0x1354   :  { %v1070_v35 = vmul.f32 %v1866_v34, %v1068_v33  ;;  %vm1075_vm15 = vweird.f32 %v1866_v34 }
0x1355   :  { %vm1076_vm2 = vmor %vm1074_vm1, %vm1075_vm15 }
0x1356   :  { %v1071_v36 = vsub.f32 1.0, %v1070_v35 }
0x1358   :  { %v1072_v37 = vmul.f32 %v1866_v34, %v1071_v36 }
0x135a   :  { %v1073_v38 = vadd.f32 %v1866_v34, %v1072_v37 }
0x135c   :  { %v1077_v41 = vsel %vm1076_vm2, %v1866_v34, %v1073_v38 }
0x135d   :  { %v1082_v43 = vsel %vm1079_vm4, %v1081_v42, %v1077_v41 }
0x135e   :  { %v1090_v47 = vmul.f32 %v1088_v46, %v1082_v43 }
0x13bb   :  { %v1093_v44 = vpop.permute.xlu0 %1092 }
0x13bc   :  { %v1095_v45 = vmul.f32 %v1093_v44, %v1082_v43 }
0x13be   :  { %1097 = vrot.lane.b32.xlu2 %v1095_v45, %s2008_s3 }
0x1418   :  { %v1098_v48 = vpop.permute.xlu2 %1097 }
0x1419   :  { %v1100_v49 = vadd.f32 %v1098_v48, %v1090_v47 }
0x141b   :  { %1867 = vtanh.f32 %v1100_v49  ;;  %1108 = vrot.lane.b32.xlu2 %v1100_v49, %s2010_s16 }
0x1421   :  { %v1868_v50 = vpop.eup %1867 }
0x1422   :  { %1103 = vrot.lane.b32.xlu0 %v1868_v50, %s2008_s3 }
0x1475   :  { %v1109_v51 = vpop.permute.xlu2 %1108 }
0x1476   :  { %1111 = vst.msk [vmem:[#allocation5] sm:$0x3] %vm178_vm0, %v1109_v51 }
0x147d   :  { %v1167_v53 = vld [vmem:[#allocation5] sm:$0x3] }
0x1494   :  { %v1104_v52 = vpop.permute.xlu0 %1103 }
0x1495   :  { %v1106_v0 = vmul.f32 %v1104_v52, %v1082_v43 }
0x1497   :  { %1113 = vrot.lane.b32.xlu1 %v1106_v0, %s2009_s15  ;;  %v1281_v0 = vld [vmem:[#allocation2 + $0x6] sm:$0x3] }
0x149f   :  { %1169 = vrot.lane.b32.xlu1 %v1167_v53, %s2008_s3 }
0x1509   :  { %v1114_v54 = vpop.permute.xlu1 %1113 }
0x150a   :  { %1116 = vst.msk [vmem:[#allocation4] sm:$0x3] %vm178_vm0, %v1114_v54 }
0x1511   :  { %v1118_v55 = vld [vmem:[#allocation4] sm:$0x3]  ;;  %v1170_v12 = vpop.permute.xlu1 %1169 }
0x1512   :  { %1768 = vmatmul.msk.f32.vlgmr.msrb.gmra.mxu1 %vm187_vm3, %v1118_v55 }
0x158f   :  { %v1143_v57 = vpop.f32.mrf.mxu1 }
0x1590   :  { %v1146_v58 = vadd.f32 %v1143_v57, %v1117_v56 }
0x1592   :  { %1869 = vtanh.f32 %v1146_v58  ;;  %v1769_v60 = vmul.f32 -1.442695, %v1146_v58 }
0x1594   :  { %1871 = vpow2.f32 %v1769_v60 }
0x1598   :  { %v1870_v59 = vpop.eup %1869 }
0x1599   :  { %1174 = vrot.lane.b32.xlu0 %v1870_v59, %s2008_s3 }
0x159a   :  { %v1872_v61 = vpop.eup %1871 }
0x159b   :  { %v1150_v62 = vadd.f32 1.0, %v1872_v61 }
0x159d   :  { %1873 = vrcp.f32 %v1150_v62  ;;  %v1162_v5 = vand.u32 2147483648, %v1150_v62  ;;  %vm1156_vm6 = vweird.f32 %v1150_v62  ;;  %v1160_v6 = vand.u32 2147483647, %v1150_v62 }
0x159f   :  { %v1163_v8 = vor.u32 1.1754944e-38, %v1162_v5  ;;  %vm1161_vm8 = vcmp.eq.f32.partialorder %v1160_v6, 8.507059e+37 }
0x15a3   :  { %v1874_v63 = vpop.eup %1873 }
0x15a4   :  { %v1152_v1 = vmul.f32 %v1874_v63, %v1150_v62  ;;  %vm1157_vm5 = vweird.f32 %v1874_v63 }
0x15a5   :  { %vm1158_vm7 = vmor %vm1156_vm6, %vm1157_vm5 }
0x15a6   :  { %v1153_v2 = vsub.f32 1.0, %v1152_v1 }
0x15a8   :  { %v1154_v3 = vmul.f32 %v1874_v63, %v1153_v2 }
0x15aa   :  { %v1155_v4 = vadd.f32 %v1874_v63, %v1154_v3 }
0x15ac   :  { %v1159_v7 = vsel %vm1158_vm7, %v1874_v63, %v1155_v4 }
0x15ad   :  { %v1164_v10 = vsel %vm1161_vm8, %v1163_v8, %v1159_v7 }
0x15ae   :  { %v1172_v13 = vmul.f32 %v1170_v12, %v1164_v10 }
0x160b   :  { %v1175_v9 = vpop.permute.xlu0 %1174 }
0x160c   :  { %v1177_v11 = vmul.f32 %v1175_v9, %v1164_v10 }
0x160e   :  { %1179 = vrot.lane.b32.xlu2 %v1177_v11, %s2008_s3 }
0x1668   :  { %v1180_v14 = vpop.permute.xlu2 %1179 }
0x1669   :  { %v1182_v15 = vadd.f32 %v1180_v14, %v1172_v13 }
0x166b   :  { %1875 = vtanh.f32 %v1182_v15  ;;  %1190 = vrot.lane.b32.xlu2 %v1182_v15, %s2010_s16 }
0x1671   :  { %v1876_v16 = vpop.eup %1875 }
0x1672   :  { %1185 = vrot.lane.b32.xlu0 %v1876_v16, %s2008_s3 }
0x16c5   :  { %v1191_v17 = vpop.permute.xlu2 %1190 }
0x16c6   :  { %1193 = vst.msk [vmem:[#allocation5] sm:$0x3] %vm178_vm0, %v1191_v17 }
0x16cd   :  { %v1249_v20 = vld [vmem:[#allocation5] sm:$0x3] }
0x16e4   :  { %v1186_v18 = vpop.permute.xlu0 %1185 }
0x16e5   :  { %v1188_v19 = vmul.f32 %v1186_v18, %v1164_v10 }
0x16e7   :  { %1195 = vrot.lane.b32.xlu1 %v1188_v19, %s2009_s15  ;;  %v1363_v19 = vld [vmem:[#allocation2 + $0x8] sm:$0x3] }
0x16ef   :  { %1251 = vrot.lane.b32.xlu1 %v1249_v20, %s2008_s3 }
0x1759   :  { %v1196_v21 = vpop.permute.xlu1 %1195 }
0x175a   :  { %1198 = vst.msk [vmem:[#allocation4] sm:$0x3] %vm178_vm0, %v1196_v21 }
0x1761   :  { %v1200_v22 = vld [vmem:[#allocation4] sm:$0x3]  ;;  %v1252_v42 = vpop.permute.xlu1 %1251 }
0x1762   :  { %1770 = vmatmul.msk.f32.vlgmr.msrb.gmra.mxu2 %vm187_vm3, %v1200_v22 }
0x17e5   :  { %v1225_v24 = vpop.f32.mrf.mxu2 }
0x17e6   :  { %v1228_v25 = vadd.f32 %v1225_v24, %v1199_v23 }
0x17e8   :  { %1877 = vtanh.f32 %v1228_v25  ;;  %v1771_v27 = vmul.f32 -1.442695, %v1228_v25 }
0x17ea   :  { %1879 = vpow2.f32 %v1771_v27 }
0x17ee   :  { %v1878_v26 = vpop.eup %1877 }
0x17ef   :  { %1256 = vrot.lane.b32.xlu0 %v1878_v26, %s2008_s3 }
0x17f0   :  { %v1880_v28 = vpop.eup %1879 }
0x17f1   :  { %v1232_v29 = vadd.f32 1.0, %v1880_v28 }
0x17f3   :  { %1881 = vrcp.f32 %v1232_v29  ;;  %v1244_v35 = vand.u32 2147483648, %v1232_v29  ;;  %vm1238_vm10 = vweird.f32 %v1232_v29  ;;  %v1242_v36 = vand.u32 2147483647, %v1232_v29 }
0x17f5   :  { %v1245_v38 = vor.u32 1.1754944e-38, %v1244_v35  ;;  %vm1243_vm12 = vcmp.eq.f32.partialorder %v1242_v36, 8.507059e+37 }
0x17f9   :  { %v1882_v30 = vpop.eup %1881 }
0x17fa   :  { %v1234_v31 = vmul.f32 %v1882_v30, %v1232_v29  ;;  %vm1239_vm9 = vweird.f32 %v1882_v30 }
0x17fb   :  { %vm1240_vm11 = vmor %vm1238_vm10, %vm1239_vm9 }
0x17fc   :  { %v1235_v32 = vsub.f32 1.0, %v1234_v31 }
0x17fe   :  { %v1236_v33 = vmul.f32 %v1882_v30, %v1235_v32 }
0x1800   :  { %v1237_v34 = vadd.f32 %v1882_v30, %v1236_v33 }
0x1802   :  { %v1241_v37 = vsel %vm1240_vm11, %v1882_v30, %v1237_v34 }
0x1803   :  { %v1246_v40 = vsel %vm1243_vm12, %v1245_v38, %v1241_v37 }
0x1804   :  { %v1254_v43 = vmul.f32 %v1252_v42, %v1246_v40 }
0x1861   :  { %v1257_v39 = vpop.permute.xlu0 %1256 }
0x1862   :  { %v1259_v41 = vmul.f32 %v1257_v39, %v1246_v40 }
0x1864   :  { %1261 = vrot.lane.b32.xlu2 %v1259_v41, %s2008_s3 }
0x18be   :  { %v1262_v44 = vpop.permute.xlu2 %1261 }
0x18bf   :  { %v1264_v45 = vadd.f32 %v1262_v44, %v1254_v43 }
0x18c1   :  { %1883 = vtanh.f32 %v1264_v45  ;;  %1272 = vrot.lane.b32.xlu2 %v1264_v45, %s2010_s16 }
0x18c7   :  { %v1884_v46 = vpop.eup %1883 }
0x18c8   :  { %1267 = vrot.lane.b32.xlu0 %v1884_v46, %s2008_s3 }
0x191b   :  { %v1273_v47 = vpop.permute.xlu2 %1272 }
0x191c   :  { %1275 = vst.msk [vmem:[#allocation5] sm:$0x3] %vm178_vm0, %v1273_v47 }
0x1923   :  { %v1331_v50 = vld [vmem:[#allocation5] sm:$0x3] }
0x193a   :  { %v1268_v48 = vpop.permute.xlu0 %1267 }
0x193b   :  { %v1270_v49 = vmul.f32 %v1268_v48, %v1246_v40 }
0x193d   :  { %1277 = vrot.lane.b32.xlu1 %v1270_v49, %s2009_s15  ;;  %v1445_v49 = vld [vmem:[#allocation2 + $0xa] sm:$0x3] }
0x1945   :  { %1333 = vrot.lane.b32.xlu1 %v1331_v50, %s2008_s3 }
0x19af   :  { %v1278_v51 = vpop.permute.xlu1 %1277 }
0x19b0   :  { %1280 = vst.msk [vmem:[#allocation4] sm:$0x3] %vm178_vm0, %v1278_v51 }
0x19b7   :  { %v1282_v52 = vld [vmem:[#allocation4] sm:$0x3]  ;;  %v1334_v8 = vpop.permute.xlu1 %1333 }
0x19b8   :  { %1772 = vmatmul.msk.f32.vlgmr.msrb.gmra.mxu3 %vm187_vm3, %v1282_v52 }
0x1a3b   :  { %v1307_v53 = vpop.f32.mrf.mxu3 }
0x1a3c   :  { %v1310_v54 = vadd.f32 %v1307_v53, %v1281_v0 }
0x1a3e   :  { %1885 = vtanh.f32 %v1310_v54  ;;  %v1773_v56 = vmul.f32 -1.442695, %v1310_v54 }
0x1a40   :  { %1887 = vpow2.f32 %v1773_v56 }
0x1a44   :  { %v1886_v55 = vpop.eup %1885 }
0x1a45   :  { %1338 = vrot.lane.b32.xlu0 %v1886_v55, %s2008_s3 }
0x1a46   :  { %v1888_v57 = vpop.eup %1887 }
0x1a47   :  { %v1314_v58 = vadd.f32 1.0, %v1888_v57 }
0x1a49   :  { %1889 = vrcp.f32 %v1314_v58  ;;  %v1326_v1 = vand.u32 2147483648, %v1314_v58  ;;  %vm1320_vm14 = vweird.f32 %v1314_v58  ;;  %v1324_v2 = vand.u32 2147483647, %v1314_v58 }
0x1a4b   :  { %v1327_v4 = vor.u32 1.1754944e-38, %v1326_v1  ;;  %vm1325_vm1 = vcmp.eq.f32.partialorder %v1324_v2, 8.507059e+37 }
0x1a4f   :  { %v1890_v59 = vpop.eup %1889 }
0x1a50   :  { %v1316_v60 = vmul.f32 %v1890_v59, %v1314_v58  ;;  %vm1321_vm13 = vweird.f32 %v1890_v59 }
0x1a51   :  { %vm1322_vm15 = vmor %vm1320_vm14, %vm1321_vm13 }
0x1a52   :  { %v1317_v61 = vsub.f32 1.0, %v1316_v60 }
0x1a54   :  { %v1318_v62 = vmul.f32 %v1890_v59, %v1317_v61 }
0x1a56   :  { %v1319_v63 = vadd.f32 %v1890_v59, %v1318_v62 }
0x1a58   :  { %v1323_v3 = vsel %vm1322_vm15, %v1890_v59, %v1319_v63 }
0x1a59   :  { %v1328_v6 = vsel %vm1325_vm1, %v1327_v4, %v1323_v3 }
0x1a5a   :  { %v1336_v9 = vmul.f32 %v1334_v8, %v1328_v6 }
0x1ab7   :  { %v1339_v5 = vpop.permute.xlu0 %1338 }
0x1ab8   :  { %v1341_v7 = vmul.f32 %v1339_v5, %v1328_v6 }
0x1aba   :  { %1343 = vrot.lane.b32.xlu2 %v1341_v7, %s2008_s3 }
0x1b14   :  { %v1344_v10 = vpop.permute.xlu2 %1343 }
0x1b15   :  { %v1346_v11 = vadd.f32 %v1344_v10, %v1336_v9 }
0x1b17   :  { %1891 = vtanh.f32 %v1346_v11  ;;  %1354 = vrot.lane.b32.xlu2 %v1346_v11, %s2010_s16 }
0x1b1d   :  { %v1892_v12 = vpop.eup %1891 }
0x1b1e   :  { %1349 = vrot.lane.b32.xlu0 %v1892_v12, %s2008_s3 }
0x1b71   :  { %v1355_v13 = vpop.permute.xlu2 %1354 }
0x1b72   :  { %1357 = vst.msk [vmem:[#allocation5] sm:$0x3] %vm178_vm0, %v1355_v13 }
0x1b79   :  { %v1413_v16 = vld [vmem:[#allocation5] sm:$0x3] }
0x1b90   :  { %v1350_v14 = vpop.permute.xlu0 %1349 }
0x1b91   :  { %v1352_v15 = vmul.f32 %v1350_v14, %v1328_v6 }
0x1b93   :  { %1359 = vrot.lane.b32.xlu1 %v1352_v15, %s2009_s15  ;;  %v1527_v15 = vld [vmem:[#allocation2 + $0xc] sm:$0x3] }
0x1b9b   :  { %1415 = vrot.lane.b32.xlu1 %v1413_v16, %s2008_s3 }
0x1c05   :  { %v1360_v17 = vpop.permute.xlu1 %1359 }
0x1c06   :  { %1362 = vst.msk [vmem:[#allocation4] sm:$0x3] %vm178_vm0, %v1360_v17 }
0x1c0d   :  { %v1364_v18 = vld [vmem:[#allocation4] sm:$0x3]  ;;  %v1416_v38 = vpop.permute.xlu1 %1415 }
0x1c0e   :  { %1774 = vmatmul.msk.f32.vlgmr.msra.gmra.mxu0 %vm187_vm3, %v1364_v18 }
0x1c8b   :  { %v1389_v20 = vpop.f32.mrf.mxu0 }
0x1c8c   :  { %v1392_v21 = vadd.f32 %v1389_v20, %v1363_v19 }
0x1c8e   :  { %1893 = vtanh.f32 %v1392_v21  ;;  %v1775_v23 = vmul.f32 -1.442695, %v1392_v21 }
0x1c90   :  { %1895 = vpow2.f32 %v1775_v23 }
0x1c94   :  { %v1894_v22 = vpop.eup %1893 }
0x1c95   :  { %1420 = vrot.lane.b32.xlu0 %v1894_v22, %s2008_s3 }
0x1c96   :  { %v1896_v24 = vpop.eup %1895 }
0x1c97   :  { %v1396_v25 = vadd.f32 1.0, %v1896_v24 }
0x1c99   :  { %1897 = vrcp.f32 %v1396_v25  ;;  %v1408_v31 = vand.u32 2147483648, %v1396_v25  ;;  %vm1402_vm4 = vweird.f32 %v1396_v25  ;;  %v1406_v32 = vand.u32 2147483647, %v1396_v25 }
0x1c9b   :  { %v1409_v34 = vor.u32 1.1754944e-38, %v1408_v31  ;;  %vm1407_vm6 = vcmp.eq.f32.partialorder %v1406_v32, 8.507059e+37 }
0x1c9f   :  { %v1898_v26 = vpop.eup %1897 }
0x1ca0   :  { %v1398_v27 = vmul.f32 %v1898_v26, %v1396_v25  ;;  %vm1403_vm2 = vweird.f32 %v1898_v26 }
0x1ca1   :  { %vm1404_vm5 = vmor %vm1402_vm4, %vm1403_vm2 }
0x1ca2   :  { %v1399_v28 = vsub.f32 1.0, %v1398_v27 }
0x1ca4   :  { %v1400_v29 = vmul.f32 %v1898_v26, %v1399_v28 }
0x1ca6   :  { %v1401_v30 = vadd.f32 %v1898_v26, %v1400_v29 }
0x1ca8   :  { %v1405_v33 = vsel %vm1404_vm5, %v1898_v26, %v1401_v30  ;;  %vm1723_vm5 = vcmask 25600  }
0x1ca9   :  { %v1410_v36 = vsel %vm1407_vm6, %v1409_v34, %v1405_v33 }
0x1caa   :  { %v1418_v39 = vmul.f32 %v1416_v38, %v1410_v36 }
0x1d07   :  { %v1421_v35 = vpop.permute.xlu0 %1420 }
0x1d08   :  { %v1423_v37 = vmul.f32 %v1421_v35, %v1410_v36 }
0x1d0a   :  { %1425 = vrot.lane.b32.xlu2 %v1423_v37, %s2008_s3 }
0x1d64   :  { %v1426_v40 = vpop.permute.xlu2 %1425 }
0x1d65   :  { %v1428_v41 = vadd.f32 %v1426_v40, %v1418_v39 }
0x1d67   :  { %1899 = vtanh.f32 %v1428_v41  ;;  %1436 = vrot.lane.b32.xlu2 %v1428_v41, %s2010_s16 }
0x1d6d   :  { %v1900_v42 = vpop.eup %1899 }
0x1d6e   :  { %1431 = vrot.lane.b32.xlu0 %v1900_v42, %s2008_s3 }
0x1dc1   :  { %v1437_v43 = vpop.permute.xlu2 %1436 }
0x1dc2   :  { %1439 = vst.msk [vmem:[#allocation5] sm:$0x3] %vm178_vm0, %v1437_v43 }
0x1dc9   :  { %v1495_v46 = vld [vmem:[#allocation5] sm:$0x3] }
0x1de0   :  { %v1432_v44 = vpop.permute.xlu0 %1431 }
0x1de1   :  { %v1434_v45 = vmul.f32 %v1432_v44, %v1410_v36 }
0x1de3   :  { %1441 = vrot.lane.b32.xlu1 %v1434_v45, %s2009_s15  ;;  %v1609_v45 = vld [vmem:[#allocation2 + $0xe] sm:$0x3] }
0x1deb   :  { %1497 = vrot.lane.b32.xlu1 %v1495_v46, %s2008_s3 }
0x1e55   :  { %v1442_v47 = vpop.permute.xlu1 %1441 }
0x1e56   :  { %1444 = vst.msk [vmem:[#allocation4] sm:$0x3] %vm178_vm0, %v1442_v47 }
0x1e5d   :  { %v1446_v48 = vld [vmem:[#allocation4] sm:$0x3]  ;;  %v1498_v4 = vpop.permute.xlu1 %1497 }
0x1e5e   :  { %1776 = vmatmul.msk.f32.vlgmr.msra.gmra.mxu1 %vm187_vm3, %v1446_v48 }
0x1edb   :  { %v1471_v50 = vpop.f32.mrf.mxu1 }
0x1edc   :  { %v1474_v51 = vadd.f32 %v1471_v50, %v1445_v49 }
0x1ede   :  { %1901 = vtanh.f32 %v1474_v51  ;;  %v1777_v0 = vmul.f32 -1.442695, %v1474_v51 }
0x1ee0   :  { %1903 = vpow2.f32 %v1777_v0 }
0x1ee4   :  { %v1902_v52 = vpop.eup %1901 }
0x1ee5   :  { %1502 = vrot.lane.b32.xlu0 %v1902_v52, %s2008_s3 }
0x1ee6   :  { %v1904_v53 = vpop.eup %1903 }
0x1ee7   :  { %v1478_v54 = vadd.f32 1.0, %v1904_v53 }
0x1ee9   :  { %1905 = vrcp.f32 %v1478_v54  ;;  %v1490_v60 = vand.u32 2147483648, %v1478_v54  ;;  %vm1484_vm8 = vweird.f32 %v1478_v54  ;;  %v1488_v61 = vand.u32 2147483647, %v1478_v54 }
0x1eeb   :  { %v1491_v63 = vor.u32 1.1754944e-38, %v1490_v60  ;;  %vm1489_vm10 = vcmp.eq.f32.partialorder %v1488_v61, 8.507059e+37 }
0x1eef   :  { %v1906_v55 = vpop.eup %1905 }
0x1ef0   :  { %v1480_v56 = vmul.f32 %v1906_v55, %v1478_v54  ;;  %vm1485_vm7 = vweird.f32 %v1906_v55 }
0x1ef1   :  { %vm1486_vm9 = vmor %vm1484_vm8, %vm1485_vm7 }
0x1ef2   :  { %v1481_v57 = vsub.f32 1.0, %v1480_v56 }
0x1ef4   :  { %v1482_v58 = vmul.f32 %v1906_v55, %v1481_v57 }
0x1ef6   :  { %v1483_v59 = vadd.f32 %v1906_v55, %v1482_v58 }
0x1ef8   :  { %v1487_v62 = vsel %vm1486_vm9, %v1906_v55, %v1483_v59 }
0x1ef9   :  { %v1492_v2 = vsel %vm1489_vm10, %v1491_v63, %v1487_v62 }
0x1efa   :  { %v1500_v5 = vmul.f32 %v1498_v4, %v1492_v2 }
0x1f57   :  { %v1503_v1 = vpop.permute.xlu0 %1502 }
0x1f58   :  { %v1505_v3 = vmul.f32 %v1503_v1, %v1492_v2 }
0x1f5a   :  { %1507 = vrot.lane.b32.xlu2 %v1505_v3, %s2008_s3 }
0x1fb4   :  { %v1508_v6 = vpop.permute.xlu2 %1507 }
0x1fb5   :  { %v1510_v7 = vadd.f32 %v1508_v6, %v1500_v5 }
0x1fb7   :  { %1907 = vtanh.f32 %v1510_v7  ;;  %1518 = vrot.lane.b32.xlu2 %v1510_v7, %s2010_s16 }
0x1fbd   :  { %v1908_v8 = vpop.eup %1907 }
0x1fbe   :  { %1513 = vrot.lane.b32.xlu0 %v1908_v8, %s2008_s3  ;;  %v1695_v8 = vld [vmem:[%s2336_s7 + $0x18] sm:$0xff] }
0x1fbf   :  { %1715 = vmatpush.msrb.mxu0 %v1695_v8 }
0x2011   :  { %v1519_v9 = vpop.permute.xlu2 %1518 }
0x2012   :  { %1521 = vst.msk [vmem:[#allocation5] sm:$0x3] %vm178_vm0, %v1519_v9  ;;  %v1694_v9 = vld [vmem:[%s2336_s7 + $0x10] sm:$0xff] }
0x2013   :  { %1716 = vmatpush.msrb.mxu0 %v1694_v9 }
0x2019   :  { %v1577_v12 = vld [vmem:[#allocation5] sm:$0x3] }
0x2030   :  { %v1514_v10 = vpop.permute.xlu0 %1513 }
0x2031   :  { %v1516_v11 = vmul.f32 %v1514_v10, %v1492_v2  ;;  %v1693_v10 = vld [vmem:[%s2336_s7 + $0x8] sm:$0xff] }
0x2032   :  { %1717 = vmatpush.msrb.mxu0 %v1693_v10 }
0x2033   :  { %1523 = vrot.lane.b32.xlu1 %v1516_v11, %s2009_s15  ;;  %v1692_v11 = vld [vmem:[%s2336_s7] sm:$0xff] }
0x2034   :  { %1718 = vmatpush.msrb.mxu0 %v1692_v11 }
0x203b   :  { %1579 = vrot.lane.b32.xlu1 %v1577_v12, %s2008_s3 }
0x20a5   :  { %v1524_v13 = vpop.permute.xlu1 %1523 }
0x20a6   :  { %1526 = vst.msk [vmem:[#allocation4] sm:$0x3] %vm178_vm0, %v1524_v13 }
0x20ad   :  { %v1528_v14 = vld [vmem:[#allocation4] sm:$0x3]  ;;  %v1580_v34 = vpop.permute.xlu1 %1579 }
0x20ae   :  { %1778 = vmatmul.msk.f32.vlgmr.msra.gmra.mxu2 %vm187_vm3, %v1528_v14  ;;  %v1796_v14 = vld [vmem:[%s2337_s8] ss:$0 sm:$0xff] }
0x2131   :  { %v1553_v16 = vpop.f32.mrf.mxu2 }
0x2132   :  { %v1556_v17 = vadd.f32 %v1553_v16, %v1527_v15 }
0x2134   :  { %1909 = vtanh.f32 %v1556_v17  ;;  %v1779_v19 = vmul.f32 -1.442695, %v1556_v17 }
0x2136   :  { %1911 = vpow2.f32 %v1779_v19 }
0x213a   :  { %v1910_v18 = vpop.eup %1909 }
0x213b   :  { %1584 = vrot.lane.b32.xlu0 %v1910_v18, %s2008_s3 }
0x213c   :  { %v1912_v20 = vpop.eup %1911 }
0x213d   :  { %v1560_v21 = vadd.f32 1.0, %v1912_v20 }
0x213f   :  { %1913 = vrcp.f32 %v1560_v21  ;;  %v1572_v27 = vand.u32 2147483648, %v1560_v21  ;;  %vm1566_vm12 = vweird.f32 %v1560_v21  ;;  %v1570_v28 = vand.u32 2147483647, %v1560_v21 }
0x2141   :  { %v1573_v30 = vor.u32 1.1754944e-38, %v1572_v27  ;;  %vm1571_vm14 = vcmp.eq.f32.partialorder %v1570_v28, 8.507059e+37 }
0x2145   :  { %v1914_v22 = vpop.eup %1913 }
0x2146   :  { %v1562_v23 = vmul.f32 %v1914_v22, %v1560_v21  ;;  %vm1567_vm11 = vweird.f32 %v1914_v22 }
0x2147   :  { %vm1568_vm13 = vmor %vm1566_vm12, %vm1567_vm11 }
0x2148   :  { %v1563_v24 = vsub.f32 1.0, %v1562_v23 }
0x214a   :  { %v1564_v25 = vmul.f32 %v1914_v22, %v1563_v24 }
0x214c   :  { %v1565_v26 = vadd.f32 %v1914_v22, %v1564_v25 }
0x214e   :  { %v1569_v29 = vsel %vm1568_vm13, %v1914_v22, %v1565_v26 }
0x214f   :  { %v1574_v32 = vsel %vm1571_vm14, %v1573_v30, %v1569_v29 }
0x2150   :  { %v1582_v35 = vmul.f32 %v1580_v34, %v1574_v32 }
0x21ad   :  { %v1585_v31 = vpop.permute.xlu0 %1584 }
0x21ae   :  { %v1587_v33 = vmul.f32 %v1585_v31, %v1574_v32 }
0x21b0   :  { %1589 = vrot.lane.b32.xlu2 %v1587_v33, %s2008_s3 }
0x220a   :  { %v1590_v36 = vpop.permute.xlu2 %1589 }
0x220b   :  { %v1592_v37 = vadd.f32 %v1590_v36, %v1582_v35 }
0x220d   :  { %1915 = vtanh.f32 %v1592_v37  ;;  %1600 = vrot.lane.b32.xlu2 %v1592_v37, %s2010_s16 }
0x2213   :  { %v1916_v38 = vpop.eup %1915 }
0x2214   :  { %1595 = vrot.lane.b32.xlu0 %v1916_v38, %s2008_s3 }
0x2267   :  { %v1601_v39 = vpop.permute.xlu2 %1600 }
0x2268   :  { %1603 = vst.msk [vmem:[#allocation5] sm:$0x3] %vm178_vm0, %v1601_v39 }
0x226f   :  { %v1659_v42 = vld [vmem:[#allocation5] sm:$0x3] }
0x2286   :  { %v1596_v40 = vpop.permute.xlu0 %1595 }
0x2287   :  { %v1598_v41 = vmul.f32 %v1596_v40, %v1574_v32 }
0x2289   :  { %1605 = vrot.lane.b32.xlu1 %v1598_v41, %s2009_s15 }
0x2291   :  { %1661 = vrot.lane.b32.xlu1 %v1659_v42, %s2008_s3 }
0x22fb   :  { %v1606_v43 = vpop.permute.xlu1 %1605 }
0x22fc   :  { %1608 = vst.msk [vmem:[#allocation4] sm:$0x3] %vm178_vm0, %v1606_v43 }
0x2303   :  { %v1610_v44 = vld [vmem:[#allocation4] sm:$0x3]  ;;  %v1662_v63 = vpop.permute.xlu1 %1661 }
0x2304   :  { %1780 = vmatmul.msk.f32.vlgmr.msra.gmra.mxu3 %vm187_vm3, %v1610_v44 }
0x2387   :  { %v1635_v46 = vpop.f32.mrf.mxu3 }
0x2388   :  { %v1638_v47 = vadd.f32 %v1635_v46, %v1609_v45 }
0x238a   :  { %1917 = vtanh.f32 %v1638_v47  ;;  %v1781_v49 = vmul.f32 -1.442695, %v1638_v47 }
0x238c   :  { %1919 = vpow2.f32 %v1781_v49 }
0x2390   :  { %v1918_v48 = vpop.eup %1917 }
0x2391   :  { %1666 = vrot.lane.b32.xlu0 %v1918_v48, %s2008_s3 }
0x2392   :  { %v1920_v50 = vpop.eup %1919 }
0x2393   :  { %v1642_v51 = vadd.f32 1.0, %v1920_v50 }
0x2395   :  { %1921 = vrcp.f32 %v1642_v51  ;;  %v1654_v56 = vand.u32 2147483648, %v1642_v51  ;;  %vm1648_vm1 = vweird.f32 %v1642_v51  ;;  %v1652_v57 = vand.u32 2147483647, %v1642_v51 }
0x2397   :  { %v1655_v59 = vor.u32 1.1754944e-38, %v1654_v56  ;;  %vm1653_vm4 = vcmp.eq.f32.partialorder %v1652_v57, 8.507059e+37 }
0x239b   :  { %v1922_v52 = vpop.eup %1921 }
0x239c   :  { %v1644_v0 = vmul.f32 %v1922_v52, %v1642_v51  ;;  %vm1649_vm15 = vweird.f32 %v1922_v52 }
0x239d   :  { %vm1650_vm2 = vmor %vm1648_vm1, %vm1649_vm15 }
0x239e   :  { %v1645_v53 = vsub.f32 1.0, %v1644_v0 }
0x23a0   :  { %v1646_v54 = vmul.f32 %v1922_v52, %v1645_v53 }
0x23a2   :  { %v1647_v55 = vadd.f32 %v1922_v52, %v1646_v54 }
0x23a4   :  { %v1651_v58 = vsel %vm1650_vm2, %v1922_v52, %v1647_v55 }
0x23a5   :  { %v1656_v61 = vsel %vm1653_vm4, %v1655_v59, %v1651_v58 }
0x23a6   :  { %v1664_v1 = vmul.f32 %v1662_v63, %v1656_v61 }
0x2403   :  { %v1667_v60 = vpop.permute.xlu0 %1666 }
0x2404   :  { %v1669_v62 = vmul.f32 %v1667_v60, %v1656_v61 }
0x2406   :  { %1671 = vrot.lane.b32.xlu2 %v1669_v62, %s2008_s3 }
0x2460   :  { %v1672_v2 = vpop.permute.xlu2 %1671 }
0x2461   :  { %v1674_v3 = vadd.f32 %v1672_v2, %v1664_v1 }
0x2463   :  { %1923 = vtanh.f32 %v1674_v3  ;;  %1682 = vrot.lane.b32.xlu2 %v1674_v3, %s2010_s16 }
0x2469   :  { %v1924_v4 = vpop.eup %1923 }
0x246a   :  { %1677 = vrot.lane.b32.xlu0 %v1924_v4, %s2008_s3 }
0x24bd   :  { %v1683_v5 = vpop.permute.xlu2 %1682 }
0x24be   :  { %1685 = vst.msk [vmem:[#allocation5] sm:$0x3] %vm178_vm0, %v1683_v5 }
0x24dc   :  { %v1678_v6 = vpop.permute.xlu0 %1677 }
0x24dd   :  { %v1680_v7 = vmul.f32 %v1678_v6, %v1656_v61 }
0x24df   :  { %1687 = vrot.lane.b32.xlu1 %v1680_v7, %s2009_s15 }
0x2551   :  { %v1688_v12 = vpop.permute.xlu1 %1687 }
0x2552   :  { %1690 = vst.msk [vmem:[#allocation4] sm:$0x3] %vm178_vm0, %v1688_v12 }
0x2559   :  { %v1691_v13 = vld [vmem:[#allocation4] sm:$0x3] }
0x255a   :  { %1782 = vmatmul.msk.f32.vlgmr.msrb.gmra.mxu0 %vm187_vm3, %v1691_v13 }
0x25d7   :  { %v1720_v15 = vpop.f32.mrf.mxu0 }
0x25d8   :  { %v1721_v16 = vadd.f32 %v1796_v14, %v1720_v15 }
0x25da   :  { %1724 = vst.msk [vmem:[#allocation11] sm:$0x3] %vm1723_vm5, %v1721_v16 }
0x25db   :  { %1735 = dma.vmem_to_hbm [thread:$0]  %s1731_s29, 32, %s1733_s11, [#allocation8]  }
0x25dc   :  { %2001 = dma.done.wait [#allocation8], 32  }
0x25dd   :  { %2002 = vsyncadd [#allocation8], 4294967264 }
0x25de   :  { %1740 = vsyncpa [#allocation7], 1 }
0x25df   :  { %1741 = vsyncpa [#allocation10], 1 }
0x25e0   :  { %1742 = vsyncpa [#allocation8], 1 }

</bundles_post_ra>
